<compile_context>
chip_gen: v5e
topology: v5e:2x2
jax: 0.10.0
libtpu: 0.0.40
codegen_flags: <defaults>
</compile_context>

<pallas_src>
import functools

import jax
import jax.numpy as jnp
from jax.experimental import pallas as pl
from jax.experimental.pallas import tpu as pltpu


# -----------------------------------------------------------------------------
# Fused Pallas kernel: full DRUNet-lite forward (head + residual body + tail)
# -----------------------------------------------------------------------------
def _drunet_fused_kernel(x0_ref, w_ref, b_ref, mask_ref, o_ref,
                         buf_a, buf_b, patch_buf, *, H, W, nc, n_resblocks):
    """All refs live in VMEM.

    x0_ref   : (nc, EXT)       input, channel-major, flat padded grid with G
                               guard lanes each side (ch0 = image, ch1 = sigma
                               map, remaining channels zero).
    w_ref    : (L, nc, 9*nc)   packed weights: W[l][co, tap*nc + ci].
    b_ref    : (L, nc, 1)      bias columns (zero-padded to nc outputs).
    mask_ref : (1, Hp*Wp)      1.0 on interior pixels of the padded grid.
    o_ref    : (1, Hp*Wp)      channel 0 of the tail conv (lane-dense).
    buf_a/b  : (nc, EXT)       VMEM ping-pong feature buffers.
    patch_buf: (9*nc, Hp*Wp)   VMEM staging for the 9-tap patch matrix.
    """
    Hp, Wp = H + 2, W + 2
    HPWP = Hp * Wp
    G = Wp + 1                  # guard lanes so all 9 flat shifts stay in-bounds

    # Zero the ping-pong buffers once: the guard lanes then stay zero forever
    # and the padded-border lanes are re-zeroed by the mask after every layer.
    buf_a[...] = jnp.zeros_like(buf_a)
    buf_b[...] = jnp.zeros_like(buf_b)

    interior = mask_ref[...] > 0.5          # (1, HPWP), hoisted once

    def conv(src_ref, layer, relu, resid_ref):
        # Gather the 9 shifted flat views into one (9*nc, HPWP) patch matrix.
        for tap in range(9):
            dy, dx = tap // 3, tap % 3
            off = (dy - 1) * Wp + (dx - 1)
            patch_buf[tap * nc:(tap + 1) * nc, :] = (
                src_ref[:, G + off:G + off + HPWP])
        # One MXU matmul per layer: (nc, 9*nc) @ (9*nc, HPWP) -> (nc, HPWP).
        acc = jnp.dot(w_ref[layer], patch_buf[...],
                      preferred_element_type=jnp.float32)
        acc = acc + b_ref[layer]            # (nc, 1) broadcast over lanes
        if relu:
            acc = jnp.maximum(acc, 0.0)
        if resid_ref is not None:
            acc = acc + resid_ref[:, G:G + HPWP]
        # Zero the padded-border positions so the next layer's halo reads 0.
        return jnp.where(interior, acc, 0.0)

    # Head.
    buf_a[:, G:G + HPWP] = conv(x0_ref, 0, relu=False, resid_ref=None)
    # Residual body: feat = feat + conv(relu(conv(feat))).
    layer = 1
    for _ in range(n_resblocks):
        buf_b[:, G:G + HPWP] = conv(buf_a, layer, relu=True, resid_ref=None)
        buf_a[:, G:G + HPWP] = conv(buf_b, layer + 1, relu=False,
                                    resid_ref=buf_a)
        layer += 2
    # Tail: only output channel 0 is real (weights zero-padded to nc outputs).
    out = conv(buf_a, layer, relu=False, resid_ref=None)
    o_ref[...] = out[0:1, :]


# -----------------------------------------------------------------------------
# Host-side packing helpers
# -----------------------------------------------------------------------------
def _pack_conv(w_hwio, b, nc):
    """Pack an HWIO (3,3,cin,cout) conv into (nc, 9*nc) / (nc, 1), zero-padded."""
    _, _, cin, cout = w_hwio.shape
    w9 = w_hwio.reshape(9, cin, cout).astype(jnp.float32)
    w9 = jnp.pad(w9, ((0, 0), (0, nc - cin), (0, nc - cout)))    # (9, nc, nc)
    wmat = jnp.transpose(w9, (2, 0, 1)).reshape(nc, 9 * nc)      # [co, tap*nc+ci]
    bvec = jnp.pad(b.astype(jnp.float32), (0, nc - cout)).reshape(nc, 1)
    return wmat, bvec


# -----------------------------------------------------------------------------
# Deterministic parameter construction (synthetic DRUNet-lite)
# -----------------------------------------------------------------------------
def init_params(key, nc=8, in_nc=2, out_nc=1, n_resblocks=2):
    def conv_init(k, cin, cout):
        kw, kb = jax.random.split(k)
        fan_in = 9 * cin
        w = jax.random.normal(kw, (3, 3, cin, cout), jnp.float32) / jnp.sqrt(fan_in)
        b = 0.01 * jax.random.normal(kb, (cout,), jnp.float32)
        return w, b

    keys = jax.random.split(key, 2 + 2 * n_resblocks)
    params = {"head": conv_init(keys[0], in_nc, nc),
              "tail": conv_init(keys[1], nc, out_nc),
              "body": []}
    for i in range(n_resblocks):
        c1 = conv_init(keys[2 + 2 * i], nc, nc)
        c2 = conv_init(keys[3 + 2 * i], nc, nc)
        params["body"].append((c1, c2))
    return params


# -----------------------------------------------------------------------------
# Forward pass matching Drunet_running.forward(x, sigma)
# -----------------------------------------------------------------------------
def drunet_running_forward(params, x_hw, sigma):
    """x_hw: (H, W) float image.  sigma: scalar.  Returns (1, 1, H, W)."""
    H, W = x_hw.shape
    nc = params["head"][0].shape[-1]
    n_resblocks = len(params["body"])
    Hp, Wp = H + 2, W + 2
    HPWP = Hp * Wp
    G = Wp + 1
    EXT = HPWP + 2 * G

    # Pack every conv into one stacked weight/bias tensor (a few KB total).
    layers = [params["head"]]
    for c1, c2 in params["body"]:
        layers += [c1, c2]
    layers.append(params["tail"])
    packed = [_pack_conv(w, b, nc) for (w, b) in layers]
    w_all = jnp.stack([p[0] for p in packed])      # (L, nc, 9*nc)
    b_all = jnp.stack([p[1] for p in packed])      # (L, nc, 1)

    # Channel-major, spatially-flattened padded input: ch0 = image, ch1 = sigma/255.
    x_pad = jnp.pad(x_hw.astype(jnp.float32), ((1, 1), (1, 1)))
    sig_pad = jnp.pad(jnp.full((H, W), jnp.float32(sigma) / 255.0),
                      ((1, 1), (1, 1)))
    x0 = jnp.zeros((nc, EXT), jnp.float32)
    x0 = x0.at[0, G:G + HPWP].set(x_pad.reshape(-1))
    x0 = x0.at[1, G:G + HPWP].set(sig_pad.reshape(-1))

    # Interior (non-padding) mask on the flat padded grid.
    rr = jnp.arange(Hp)[:, None]
    cc = jnp.arange(Wp)[None, :]
    mask = (((rr >= 1) & (rr <= H) & (cc >= 1) & (cc <= W))
            .astype(jnp.float32).reshape(1, HPWP))

    kernel = functools.partial(_drunet_fused_kernel, H=H, W=W, nc=nc,
                               n_resblocks=n_resblocks)
    vmem = pl.BlockSpec(memory_space=pltpu.MemorySpace.VMEM)
    out_flat = pl.pallas_call(
        kernel,
        out_shape=jax.ShapeDtypeStruct((1, HPWP), jnp.float32),
        in_specs=[vmem, vmem, vmem, vmem],
        out_specs=vmem,
        scratch_shapes=[
            pltpu.VMEM((nc, EXT), jnp.float32),       # ping feature buffer
            pltpu.VMEM((nc, EXT), jnp.float32),       # pong feature buffer
            pltpu.VMEM((9 * nc, HPWP), jnp.float32),  # 9-tap patch staging
        ],
    )(x0, w_all, b_all, mask)

    out_hw = out_flat.reshape(Hp, Wp)[1:H + 1, 1:W + 1]
    return out_hw[None, None, :, :]        # PyTorch NCHW: (1, 1, H, W)


# -----------------------------------------------------------------------------
# Pure-JAX reference (for correctness checking)
# -----------------------------------------------------------------------------
def _conv3x3_ref(x_hwc, w, b):
    y = jax.lax.conv_general_dilated(
        x_hwc[None].astype(jnp.float32), w.astype(jnp.float32),
        window_strides=(1, 1), padding="SAME",
        dimension_numbers=("NHWC", "HWIO", "NHWC"))[0]
    return y + b


def drunet_reference(params, x_hw, sigma):
    H, W = x_hw.shape
    sig = jnp.full((H, W, 1), jnp.float32(sigma) / 255.0)
    x = jnp.concatenate([x_hw.astype(jnp.float32)[..., None], sig], axis=-1)
    w, b = params["head"]
    feat = _conv3x3_ref(x, w, b)
    for (w1, b1), (w2, b2) in params["body"]:
        h = jnp.maximum(_conv3x3_ref(feat, w1, b1), 0.0)
        feat = feat + _conv3x3_ref(h, w2, b2)
    w, b = params["tail"]
    out = _conv3x3_ref(feat, w, b)                 # (H, W, 1)
    return jnp.transpose(out, (2, 0, 1))[None]     # (1, 1, H, W)


if __name__ == "__main__":
    key = jax.random.PRNGKey(0)
    k_params, k_x = jax.random.split(key)

    H, W = 16, 16
    params = init_params(k_params, nc=8, in_nc=2, out_nc=1, n_resblocks=2)
    x = jax.random.uniform(k_x, (H, W), jnp.float32)   # grayscale image in [0,1)
    sigma = 15.0

    out = drunet_running_forward(params, x, sigma)
    out = jax.block_until_ready(out)
    assert out.shape == (1, 1, H, W), out.shape
    assert jnp.all(jnp.isfinite(out))

    ref = drunet_reference(params, x, sigma)
    max_err = float(jnp.max(jnp.abs(out - ref)))
    assert jnp.allclose(out, ref, atol=5e-2, rtol=5e-2), max_err

    print("KERNEL_OK")
</pallas_src>

<mosaic_0001>
module attributes {stable_mosaic.version = 11 : i64} {
  func.func @_drunet_fused_kernel(%arg0: memref<8x362xf32, #tpu.memory_space<vmem>>, %arg1: memref<6x8x72xf32, #tpu.memory_space<vmem>>, %arg2: memref<6x8x1xf32, #tpu.memory_space<vmem>>, %arg3: memref<1x324xf32, #tpu.memory_space<vmem>>, %arg4: memref<1x324xf32, #tpu.memory_space<vmem>>, %arg5: memref<8x362xf32, #tpu.memory_space<vmem>>, %arg6: memref<8x362xf32, #tpu.memory_space<vmem>>, %arg7: memref<72x324xf32, #tpu.memory_space<vmem>>) attributes {dimension_semantics = [], scalar_prefetch = 0 : i64, scratch_operands = 3 : i64, tpu.core_type = #tpu.core_type<tc>} {
    %cst = arith.constant 0.000000e+00 : f32
    %0 = vector.broadcast %cst : f32 to vector<8x362xf32>
    %c0 = arith.constant 0 : index
    %c0_0 = arith.constant 0 : index
    %1 = vector.load %arg5[%c0, %c0_0] : memref<8x362xf32, #tpu.memory_space<vmem>>, vector<8x362xf32>
    tpu.vector_store %arg5[%c0, %c0_0], %0 {strides = array<i32>} : memref<8x362xf32, #tpu.memory_space<vmem>>, vector<8x362xf32>,
    %cst_1 = arith.constant 0.000000e+00 : f32
    %2 = vector.broadcast %cst_1 : f32 to vector<8x362xf32>
    %c0_2 = arith.constant 0 : index
    %c0_3 = arith.constant 0 : index
    %3 = vector.load %arg6[%c0_2, %c0_3] : memref<8x362xf32, #tpu.memory_space<vmem>>, vector<8x362xf32>
    tpu.vector_store %arg6[%c0_2, %c0_3], %2 {strides = array<i32>} : memref<8x362xf32, #tpu.memory_space<vmem>>, vector<8x362xf32>,
    %c0_4 = arith.constant 0 : index
    %c0_5 = arith.constant 0 : index
    %4 = vector.load %arg3[%c0_4, %c0_5] : memref<1x324xf32, #tpu.memory_space<vmem>>, vector<1x324xf32>
    %cst_6 = arith.constant 5.000000e-01 : f32
    %5 = vector.broadcast %cst_6 : f32 to vector<1x324xf32>
    %6 = arith.cmpf ogt, %4, %5 : vector<1x324xf32>
    %c0_7 = arith.constant 0 : index
    %c0_8 = arith.constant 0 : index
    %7 = vector.load %arg0[%c0_7, %c0_8] : memref<8x362xf32, #tpu.memory_space<vmem>>, vector<8x324xf32>
    %c0_9 = arith.constant 0 : index
    %c0_10 = arith.constant 0 : index
    %8 = vector.load %arg7[%c0_9, %c0_10] : memref<72x324xf32, #tpu.memory_space<vmem>>, vector<8x324xf32>
    tpu.vector_store %arg7[%c0_9, %c0_10], %7 {strides = array<i32>} : memref<72x324xf32, #tpu.memory_space<vmem>>, vector<8x324xf32>,
    %c0_11 = arith.constant 0 : index
    %c1 = arith.constant 1 : index
    %9 = vector.load %arg0[%c0_11, %c1] : memref<8x362xf32, #tpu.memory_space<vmem>>, vector<8x324xf32>
    %c8 = arith.constant 8 : index
    %c0_12 = arith.constant 0 : index
    %10 = vector.load %arg7[%c8, %c0_12] : memref<72x324xf32, #tpu.memory_space<vmem>>, vector<8x324xf32>
    tpu.vector_store %arg7[%c8, %c0_12], %9 {strides = array<i32>} : memref<72x324xf32, #tpu.memory_space<vmem>>, vector<8x324xf32>,
    %c0_13 = arith.constant 0 : index
    %c2 = arith.constant 2 : index
    %11 = vector.load %arg0[%c0_13, %c2] : memref<8x362xf32, #tpu.memory_space<vmem>>, vector<8x324xf32>
    %c16 = arith.constant 16 : index
    %c0_14 = arith.constant 0 : index
    %12 = vector.load %arg7[%c16, %c0_14] : memref<72x324xf32, #tpu.memory_space<vmem>>, vector<8x324xf32>
    tpu.vector_store %arg7[%c16, %c0_14], %11 {strides = array<i32>} : memref<72x324xf32, #tpu.memory_space<vmem>>, vector<8x324xf32>,
    %c0_15 = arith.constant 0 : index
    %c18 = arith.constant 18 : index
    %13 = vector.load %arg0[%c0_15, %c18] : memref<8x362xf32, #tpu.memory_space<vmem>>, vector<8x324xf32>
    %c24 = arith.constant 24 : index
    %c0_16 = arith.constant 0 : index
    %14 = vector.load %arg7[%c24, %c0_16] : memref<72x324xf32, #tpu.memory_space<vmem>>, vector<8x324xf32>
    tpu.vector_store %arg7[%c24, %c0_16], %13 {strides = array<i32>} : memref<72x324xf32, #tpu.memory_space<vmem>>, vector<8x324xf32>,
    %c0_17 = arith.constant 0 : index
    %c19 = arith.constant 19 : index
    %15 = vector.load %arg0[%c0_17, %c19] : memref<8x362xf32, #tpu.memory_space<vmem>>, vector<8x324xf32>
    %c32 = arith.constant 32 : index
    %c0_18 = arith.constant 0 : index
    %16 = vector.load %arg7[%c32, %c0_18] : memref<72x324xf32, #tpu.memory_space<vmem>>, vector<8x324xf32>
    tpu.vector_store %arg7[%c32, %c0_18], %15 {strides = array<i32>} : memref<72x324xf32, #tpu.memory_space<vmem>>, vector<8x324xf32>,
    %c0_19 = arith.constant 0 : index
    %c20 = arith.constant 20 : index
    %17 = vector.load %arg0[%c0_19, %c20] : memref<8x362xf32, #tpu.memory_space<vmem>>, vector<8x324xf32>
    %c40 = arith.constant 40 : index
    %c0_20 = arith.constant 0 : index
    %18 = vector.load %arg7[%c40, %c0_20] : memref<72x324xf32, #tpu.memory_space<vmem>>, vector<8x324xf32>
    tpu.vector_store %arg7[%c40, %c0_20], %17 {strides = array<i32>} : memref<72x324xf32, #tpu.memory_space<vmem>>, vector<8x324xf32>,
    %c0_21 = arith.constant 0 : index
    %c36 = arith.constant 36 : index
    %19 = vector.load %arg0[%c0_21, %c36] : memref<8x362xf32, #tpu.memory_space<vmem>>, vector<8x324xf32>
    %c48 = arith.constant 48 : index
    %c0_22 = arith.constant 0 : index
    %20 = vector.load %arg7[%c48, %c0_22] : memref<72x324xf32, #tpu.memory_space<vmem>>, vector<8x324xf32>
    tpu.vector_store %arg7[%c48, %c0_22], %19 {strides = array<i32>} : memref<72x324xf32, #tpu.memory_space<vmem>>, vector<8x324xf32>,
    %c0_23 = arith.constant 0 : index
    %c37 = arith.constant 37 : index
    %21 = vector.load %arg0[%c0_23, %c37] : memref<8x362xf32, #tpu.memory_space<vmem>>, vector<8x324xf32>
    %c56 = arith.constant 56 : index
    %c0_24 = arith.constant 0 : index
    %22 = vector.load %arg7[%c56, %c0_24] : memref<72x324xf32, #tpu.memory_space<vmem>>, vector<8x324xf32>
    tpu.vector_store %arg7[%c56, %c0_24], %21 {strides = array<i32>} : memref<72x324xf32, #tpu.memory_space<vmem>>, vector<8x324xf32>,
    %c0_25 = arith.constant 0 : index
    %c38 = arith.constant 38 : index
    %23 = vector.load %arg0[%c0_25, %c38] : memref<8x362xf32, #tpu.memory_space<vmem>>, vector<8x324xf32>
    %c64 = arith.constant 64 : index
    %c0_26 = arith.constant 0 : index
    %24 = vector.load %arg7[%c64, %c0_26] : memref<72x324xf32, #tpu.memory_space<vmem>>, vector<8x324xf32>
    tpu.vector_store %arg7[%c64, %c0_26], %23 {strides = array<i32>} : memref<72x324xf32, #tpu.memory_space<vmem>>, vector<8x324xf32>,
    %c0_27 = arith.constant 0 : index
    %c0_28 = arith.constant 0 : index
    %c0_29 = arith.constant 0 : index
    %25 = vector.load %arg1[%c0_27, %c0_28, %c0_29] : memref<6x8x72xf32, #tpu.memory_space<vmem>>, vector<1x8x72xf32>
    %26 = vector.shape_cast %25 : vector<1x8x72xf32> to vector<8x72xf32>
    %c0_30 = arith.constant 0 : index
    %c0_31 = arith.constant 0 : index
    %27 = vector.load %arg7[%c0_30, %c0_31] : memref<72x324xf32, #tpu.memory_space<vmem>>, vector<72x324xf32>
    %cst_32 = arith.constant dense<0.000000e+00> : vector<8x324xf32>
    %28 = tpu.matmul %26, %27, %cst_32 {dimension_numbers = #tpu.dot_dimension_numbers<[1], [0], [0], [1], [0, 0, 1, 1], [], []>} : vector<8x72xf32>, vector<72x324xf32>, vector<8x324xf32> -> vector<8x324xf32>
    %c0_33 = arith.constant 0 : index
    %c0_34 = arith.constant 0 : index
    %c0_35 = arith.constant 0 : index
    %29 = vector.load %arg2[%c0_33, %c0_34, %c0_35] : memref<6x8x1xf32, #tpu.memory_space<vmem>>, vector<1x8x1xf32>
    %30 = vector.shape_cast %29 : vector<1x8x1xf32> to vector<8x1xf32>
    %31 = vector.broadcast %30 : vector<8x1xf32> to vector<8x324xf32>
    %32 = arith.addf %28, %31 : vector<8x324xf32>
    %cst_36 = arith.constant 0.000000e+00 : f32
    %33 = vector.shape_cast %6 : vector<1x324xi1> to vector<1x324xi1>
    %34 = vector.broadcast %33 : vector<1x324xi1> to vector<8x324xi1>
    %35 = vector.broadcast %cst_36 : f32 to vector<8x324xf32>
    %36 = arith.select %34, %32, %35 : vector<8x324xi1>, vector<8x324xf32>
    %c0_37 = arith.constant 0 : index
    %c19_38 = arith.constant 19 : index
    %37 = vector.load %arg5[%c0_37, %c19_38] : memref<8x362xf32, #tpu.memory_space<vmem>>, vector<8x324xf32>
    tpu.vector_store %arg5[%c0_37, %c19_38], %36 {strides = array<i32>} : memref<8x362xf32, #tpu.memory_space<vmem>>, vector<8x324xf32>,
    %c0_39 = arith.constant 0 : index
    %c0_40 = arith.constant 0 : index
    %38 = vector.load %arg5[%c0_39, %c0_40] : memref<8x362xf32, #tpu.memory_space<vmem>>, vector<8x324xf32>
    %c0_41 = arith.constant 0 : index
    %c0_42 = arith.constant 0 : index
    %39 = vector.load %arg7[%c0_41, %c0_42] : memref<72x324xf32, #tpu.memory_space<vmem>>, vector<8x324xf32>
    tpu.vector_store %arg7[%c0_41, %c0_42], %38 {strides = array<i32>} : memref<72x324xf32, #tpu.memory_space<vmem>>, vector<8x324xf32>,
    %c0_43 = arith.constant 0 : index
    %c1_44 = arith.constant 1 : index
    %40 = vector.load %arg5[%c0_43, %c1_44] : memref<8x362xf32, #tpu.memory_space<vmem>>, vector<8x324xf32>
    %c8_45 = arith.constant 8 : index
    %c0_46 = arith.constant 0 : index
    %41 = vector.load %arg7[%c8_45, %c0_46] : memref<72x324xf32, #tpu.memory_space<vmem>>, vector<8x324xf32>
    tpu.vector_store %arg7[%c8_45, %c0_46], %40 {strides = array<i32>} : memref<72x324xf32, #tpu.memory_space<vmem>>, vector<8x324xf32>,
    %c0_47 = arith.constant 0 : index
    %c2_48 = arith.constant 2 : index
    %42 = vector.load %arg5[%c0_47, %c2_48] : memref<8x362xf32, #tpu.memory_space<vmem>>, vector<8x324xf32>
    %c16_49 = arith.constant 16 : index
    %c0_50 = arith.constant 0 : index
    %43 = vector.load %arg7[%c16_49, %c0_50] : memref<72x324xf32, #tpu.memory_space<vmem>>, vector<8x324xf32>
    tpu.vector_store %arg7[%c16_49, %c0_50], %42 {strides = array<i32>} : memref<72x324xf32, #tpu.memory_space<vmem>>, vector<8x324xf32>,
    %c0_51 = arith.constant 0 : index
    %c18_52 = arith.constant 18 : index
    %44 = vector.load %arg5[%c0_51, %c18_52] : memref<8x362xf32, #tpu.memory_space<vmem>>, vector<8x324xf32>
    %c24_53 = arith.constant 24 : index
    %c0_54 = arith.constant 0 : index
    %45 = vector.load %arg7[%c24_53, %c0_54] : memref<72x324xf32, #tpu.memory_space<vmem>>, vector<8x324xf32>
    tpu.vector_store %arg7[%c24_53, %c0_54], %44 {strides = array<i32>} : memref<72x324xf32, #tpu.memory_space<vmem>>, vector<8x324xf32>,
    %c0_55 = arith.constant 0 : index
    %c19_56 = arith.constant 19 : index
    %46 = vector.load %arg5[%c0_55, %c19_56] : memref<8x362xf32, #tpu.memory_space<vmem>>, vector<8x324xf32>
    %c32_57 = arith.constant 32 : index
    %c0_58 = arith.constant 0 : index
    %47 = vector.load %arg7[%c32_57, %c0_58] : memref<72x324xf32, #tpu.memory_space<vmem>>, vector<8x324xf32>
    tpu.vector_store %arg7[%c32_57, %c0_58], %46 {strides = array<i32>} : memref<72x324xf32, #tpu.memory_space<vmem>>, vector<8x324xf32>,
    %c0_59 = arith.constant 0 : index
    %c20_60 = arith.constant 20 : index
    %48 = vector.load %arg5[%c0_59, %c20_60] : memref<8x362xf32, #tpu.memory_space<vmem>>, vector<8x324xf32>
    %c40_61 = arith.constant 40 : index
    %c0_62 = arith.constant 0 : index
    %49 = vector.load %arg7[%c40_61, %c0_62] : memref<72x324xf32, #tpu.memory_space<vmem>>, vector<8x324xf32>
    tpu.vector_store %arg7[%c40_61, %c0_62], %48 {strides = array<i32>} : memref<72x324xf32, #tpu.memory_space<vmem>>, vector<8x324xf32>,
    %c0_63 = arith.constant 0 : index
    %c36_64 = arith.constant 36 : index
    %50 = vector.load %arg5[%c0_63, %c36_64] : memref<8x362xf32, #tpu.memory_space<vmem>>, vector<8x324xf32>
    %c48_65 = arith.constant 48 : index
    %c0_66 = arith.constant 0 : index
    %51 = vector.load %arg7[%c48_65, %c0_66] : memref<72x324xf32, #tpu.memory_space<vmem>>, vector<8x324xf32>
    tpu.vector_store %arg7[%c48_65, %c0_66], %50 {strides = array<i32>} : memref<72x324xf32, #tpu.memory_space<vmem>>, vector<8x324xf32>,
    %c0_67 = arith.constant 0 : index
    %c37_68 = arith.constant 37 : index
    %52 = vector.load %arg5[%c0_67, %c37_68] : memref<8x362xf32, #tpu.memory_space<vmem>>, vector<8x324xf32>
    %c56_69 = arith.constant 56 : index
    %c0_70 = arith.constant 0 : index
    %53 = vector.load %arg7[%c56_69, %c0_70] : memref<72x324xf32, #tpu.memory_space<vmem>>, vector<8x324xf32>
    tpu.vector_store %arg7[%c56_69, %c0_70], %52 {strides = array<i32>} : memref<72x324xf32, #tpu.memory_space<vmem>>, vector<8x324xf32>,
    %c0_71 = arith.constant 0 : index
    %c38_72 = arith.constant 38 : index
    %54 = vector.load %arg5[%c0_71, %c38_72] : memref<8x362xf32, #tpu.memory_space<vmem>>, vector<8x324xf32>
    %c64_73 = arith.constant 64 : index
    %c0_74 = arith.constant 0 : index
    %55 = vector.load %arg7[%c64_73, %c0_74] : memref<72x324xf32, #tpu.memory_space<vmem>>, vector<8x324xf32>
    tpu.vector_store %arg7[%c64_73, %c0_74], %54 {strides = array<i32>} : memref<72x324xf32, #tpu.memory_space<vmem>>, vector<8x324xf32>,
    %c1_75 = arith.constant 1 : index
    %c0_76 = arith.constant 0 : index
    %c0_77 = arith.constant 0 : index
    %56 = vector.load %arg1[%c1_75, %c0_76, %c0_77] : memref<6x8x72xf32, #tpu.memory_space<vmem>>, vector<1x8x72xf32>
    %57 = vector.shape_cast %56 : vector<1x8x72xf32> to vector<8x72xf32>
    %c0_78 = arith.constant 0 : index
    %c0_79 = arith.constant 0 : index
    %58 = vector.load %arg7[%c0_78, %c0_79] : memref<72x324xf32, #tpu.memory_space<vmem>>, vector<72x324xf32>
    %cst_80 = arith.constant dense<0.000000e+00> : vector<8x324xf32>
    %59 = tpu.matmul %57, %58, %cst_80 {dimension_numbers = #tpu.dot_dimension_numbers<[1], [0], [0], [1], [0, 0, 1, 1], [], []>} : vector<8x72xf32>, vector<72x324xf32>, vector<8x324xf32> -> vector<8x324xf32>
    %c1_81 = arith.constant 1 : index
    %c0_82 = arith.constant 0 : index
    %c0_83 = arith.constant 0 : index
    %60 = vector.load %arg2[%c1_81, %c0_82, %c0_83] : memref<6x8x1xf32, #tpu.memory_space<vmem>>, vector<1x8x1xf32>
    %61 = vector.shape_cast %60 : vector<1x8x1xf32> to vector<8x1xf32>
    %62 = vector.broadcast %61 : vector<8x1xf32> to vector<8x324xf32>
    %63 = arith.addf %59, %62 : vector<8x324xf32>
    %cst_84 = arith.constant 0.000000e+00 : f32
    %64 = vector.broadcast %cst_84 : f32 to vector<8x324xf32>
    %65 = arith.maximumf %63, %64 : vector<8x324xf32>
    %cst_85 = arith.constant 0.000000e+00 : f32
    %66 = vector.shape_cast %6 : vector<1x324xi1> to vector<1x324xi1>
    %67 = vector.broadcast %66 : vector<1x324xi1> to vector<8x324xi1>
    %68 = vector.broadcast %cst_85 : f32 to vector<8x324xf32>
    %69 = arith.select %67, %65, %68 : vector<8x324xi1>, vector<8x324xf32>
    %c0_86 = arith.constant 0 : index
    %c19_87 = arith.constant 19 : index
    %70 = vector.load %arg6[%c0_86, %c19_87] : memref<8x362xf32, #tpu.memory_space<vmem>>, vector<8x324xf32>
    tpu.vector_store %arg6[%c0_86, %c19_87], %69 {strides = array<i32>} : memref<8x362xf32, #tpu.memory_space<vmem>>, vector<8x324xf32>,
    %c0_88 = arith.constant 0 : index
    %c0_89 = arith.constant 0 : index
    %71 = vector.load %arg6[%c0_88, %c0_89] : memref<8x362xf32, #tpu.memory_space<vmem>>, vector<8x324xf32>
    %c0_90 = arith.constant 0 : index
    %c0_91 = arith.constant 0 : index
    %72 = vector.load %arg7[%c0_90, %c0_91] : memref<72x324xf32, #tpu.memory_space<vmem>>, vector<8x324xf32>
    tpu.vector_store %arg7[%c0_90, %c0_91], %71 {strides = array<i32>} : memref<72x324xf32, #tpu.memory_space<vmem>>, vector<8x324xf32>,
    %c0_92 = arith.constant 0 : index
    %c1_93 = arith.constant 1 : index
    %73 = vector.load %arg6[%c0_92, %c1_93] : memref<8x362xf32, #tpu.memory_space<vmem>>, vector<8x324xf32>
    %c8_94 = arith.constant 8 : index
    %c0_95 = arith.constant 0 : index
    %74 = vector.load %arg7[%c8_94, %c0_95] : memref<72x324xf32, #tpu.memory_space<vmem>>, vector<8x324xf32>
    tpu.vector_store %arg7[%c8_94, %c0_95], %73 {strides = array<i32>} : memref<72x324xf32, #tpu.memory_space<vmem>>, vector<8x324xf32>,
    %c0_96 = arith.constant 0 : index
    %c2_97 = arith.constant 2 : index
    %75 = vector.load %arg6[%c0_96, %c2_97] : memref<8x362xf32, #tpu.memory_space<vmem>>, vector<8x324xf32>
    %c16_98 = arith.constant 16 : index
    %c0_99 = arith.constant 0 : index
    %76 = vector.load %arg7[%c16_98, %c0_99] : memref<72x324xf32, #tpu.memory_space<vmem>>, vector<8x324xf32>
    tpu.vector_store %arg7[%c16_98, %c0_99], %75 {strides = array<i32>} : memref<72x324xf32, #tpu.memory_space<vmem>>, vector<8x324xf32>,
    %c0_100 = arith.constant 0 : index
    %c18_101 = arith.constant 18 : index
    %77 = vector.load %arg6[%c0_100, %c18_101] : memref<8x362xf32, #tpu.memory_space<vmem>>, vector<8x324xf32>
    %c24_102 = arith.constant 24 : index
    %c0_103 = arith.constant 0 : index
    %78 = vector.load %arg7[%c24_102, %c0_103] : memref<72x324xf32, #tpu.memory_space<vmem>>, vector<8x324xf32>
    tpu.vector_store %arg7[%c24_102, %c0_103], %77 {strides = array<i32>} : memref<72x324xf32, #tpu.memory_space<vmem>>, vector<8x324xf32>,
    %c0_104 = arith.constant 0 : index
    %c19_105 = arith.constant 19 : index
    %79 = vector.load %arg6[%c0_104, %c19_105] : memref<8x362xf32, #tpu.memory_space<vmem>>, vector<8x324xf32>
    %c32_106 = arith.constant 32 : index
    %c0_107 = arith.constant 0 : index
    %80 = vector.load %arg7[%c32_106, %c0_107] : memref<72x324xf32, #tpu.memory_space<vmem>>, vector<8x324xf32>
    tpu.vector_store %arg7[%c32_106, %c0_107], %79 {strides = array<i32>} : memref<72x324xf32, #tpu.memory_space<vmem>>, vector<8x324xf32>,
    %c0_108 = arith.constant 0 : index
    %c20_109 = arith.constant 20 : index
    %81 = vector.load %arg6[%c0_108, %c20_109] : memref<8x362xf32, #tpu.memory_space<vmem>>, vector<8x324xf32>
    %c40_110 = arith.constant 40 : index
    %c0_111 = arith.constant 0 : index
    %82 = vector.load %arg7[%c40_110, %c0_111] : memref<72x324xf32, #tpu.memory_space<vmem>>, vector<8x324xf32>
    tpu.vector_store %arg7[%c40_110, %c0_111], %81 {strides = array<i32>} : memref<72x324xf32, #tpu.memory_space<vmem>>, vector<8x324xf32>,
    %c0_112 = arith.constant 0 : index
    %c36_113 = arith.constant 36 : index
    %83 = vector.load %arg6[%c0_112, %c36_113] : memref<8x362xf32, #tpu.memory_space<vmem>>, vector<8x324xf32>
    %c48_114 = arith.constant 48 : index
    %c0_115 = arith.constant 0 : index
    %84 = vector.load %arg7[%c48_114, %c0_115] : memref<72x324xf32, #tpu.memory_space<vmem>>, vector<8x324xf32>
    tpu.vector_store %arg7[%c48_114, %c0_115], %83 {strides = array<i32>} : memref<72x324xf32, #tpu.memory_space<vmem>>, vector<8x324xf32>,
    %c0_116 = arith.constant 0 : index
    %c37_117 = arith.constant 37 : index
    %85 = vector.load %arg6[%c0_116, %c37_117] : memref<8x362xf32, #tpu.memory_space<vmem>>, vector<8x324xf32>
    %c56_118 = arith.constant 56 : index
    %c0_119 = arith.constant 0 : index
    %86 = vector.load %arg7[%c56_118, %c0_119] : memref<72x324xf32, #tpu.memory_space<vmem>>, vector<8x324xf32>
    tpu.vector_store %arg7[%c56_118, %c0_119], %85 {strides = array<i32>} : memref<72x324xf32, #tpu.memory_space<vmem>>, vector<8x324xf32>,
    %c0_120 = arith.constant 0 : index
    %c38_121 = arith.constant 38 : index
    %87 = vector.load %arg6[%c0_120, %c38_121] : memref<8x362xf32, #tpu.memory_space<vmem>>, vector<8x324xf32>
    %c64_122 = arith.constant 64 : index
    %c0_123 = arith.constant 0 : index
    %88 = vector.load %arg7[%c64_122, %c0_123] : memref<72x324xf32, #tpu.memory_space<vmem>>, vector<8x324xf32>
    tpu.vector_store %arg7[%c64_122, %c0_123], %87 {strides = array<i32>} : memref<72x324xf32, #tpu.memory_space<vmem>>, vector<8x324xf32>,
    %c2_124 = arith.constant 2 : index
    %c0_125 = arith.constant 0 : index
    %c0_126 = arith.constant 0 : index
    %89 = vector.load %arg1[%c2_124, %c0_125, %c0_126] : memref<6x8x72xf32, #tpu.memory_space<vmem>>, vector<1x8x72xf32>
    %90 = vector.shape_cast %89 : vector<1x8x72xf32> to vector<8x72xf32>
    %c0_127 = arith.constant 0 : index
    %c0_128 = arith.constant 0 : index
    %91 = vector.load %arg7[%c0_127, %c0_128] : memref<72x324xf32, #tpu.memory_space<vmem>>, vector<72x324xf32>
    %cst_129 = arith.constant dense<0.000000e+00> : vector<8x324xf32>
    %92 = tpu.matmul %90, %91, %cst_129 {dimension_numbers = #tpu.dot_dimension_numbers<[1], [0], [0], [1], [0, 0, 1, 1], [], []>} : vector<8x72xf32>, vector<72x324xf32>, vector<8x324xf32> -> vector<8x324xf32>
    %c2_130 = arith.constant 2 : index
    %c0_131 = arith.constant 0 : index
    %c0_132 = arith.constant 0 : index
    %93 = vector.load %arg2[%c2_130, %c0_131, %c0_132] : memref<6x8x1xf32, #tpu.memory_space<vmem>>, vector<1x8x1xf32>
    %94 = vector.shape_cast %93 : vector<1x8x1xf32> to vector<8x1xf32>
    %95 = vector.broadcast %94 : vector<8x1xf32> to vector<8x324xf32>
    %96 = arith.addf %92, %95 : vector<8x324xf32>
    %c0_133 = arith.constant 0 : index
    %c19_134 = arith.constant 19 : index
    %97 = vector.load %arg5[%c0_133, %c19_134] : memref<8x362xf32, #tpu.memory_space<vmem>>, vector<8x324xf32>
    %98 = arith.addf %96, %97 : vector<8x324xf32>
    %cst_135 = arith.constant 0.000000e+00 : f32
    %99 = vector.shape_cast %6 : vector<1x324xi1> to vector<1x324xi1>
    %100 = vector.broadcast %99 : vector<1x324xi1> to vector<8x324xi1>
    %101 = vector.broadcast %cst_135 : f32 to vector<8x324xf32>
    %102 = arith.select %100, %98, %101 : vector<8x324xi1>, vector<8x324xf32>
    %c0_136 = arith.constant 0 : index
    %c19_137 = arith.constant 19 : index
    %103 = vector.load %arg5[%c0_136, %c19_137] : memref<8x362xf32, #tpu.memory_space<vmem>>, vector<8x324xf32>
    tpu.vector_store %arg5[%c0_136, %c19_137], %102 {strides = array<i32>} : memref<8x362xf32, #tpu.memory_space<vmem>>, vector<8x324xf32>,
    %c0_138 = arith.constant 0 : index
    %c0_139 = arith.constant 0 : index
    %104 = vector.load %arg5[%c0_138, %c0_139] : memref<8x362xf32, #tpu.memory_space<vmem>>, vector<8x324xf32>
    %c0_140 = arith.constant 0 : index
    %c0_141 = arith.constant 0 : index
    %105 = vector.load %arg7[%c0_140, %c0_141] : memref<72x324xf32, #tpu.memory_space<vmem>>, vector<8x324xf32>
    tpu.vector_store %arg7[%c0_140, %c0_141], %104 {strides = array<i32>} : memref<72x324xf32, #tpu.memory_space<vmem>>, vector<8x324xf32>,
    %c0_142 = arith.constant 0 : index
    %c1_143 = arith.constant 1 : index
    %106 = vector.load %arg5[%c0_142, %c1_143] : memref<8x362xf32, #tpu.memory_space<vmem>>, vector<8x324xf32>
    %c8_144 = arith.constant 8 : index
    %c0_145 = arith.constant 0 : index
    %107 = vector.load %arg7[%c8_144, %c0_145] : memref<72x324xf32, #tpu.memory_space<vmem>>, vector<8x324xf32>
    tpu.vector_store %arg7[%c8_144, %c0_145], %106 {strides = array<i32>} : memref<72x324xf32, #tpu.memory_space<vmem>>, vector<8x324xf32>,
    %c0_146 = arith.constant 0 : index
    %c2_147 = arith.constant 2 : index
    %108 = vector.load %arg5[%c0_146, %c2_147] : memref<8x362xf32, #tpu.memory_space<vmem>>, vector<8x324xf32>
    %c16_148 = arith.constant 16 : index
    %c0_149 = arith.constant 0 : index
    %109 = vector.load %arg7[%c16_148, %c0_149] : memref<72x324xf32, #tpu.memory_space<vmem>>, vector<8x324xf32>
    tpu.vector_store %arg7[%c16_148, %c0_149], %108 {strides = array<i32>} : memref<72x324xf32, #tpu.memory_space<vmem>>, vector<8x324xf32>,
    %c0_150 = arith.constant 0 : index
    %c18_151 = arith.constant 18 : index
    %110 = vector.load %arg5[%c0_150, %c18_151] : memref<8x362xf32, #tpu.memory_space<vmem>>, vector<8x324xf32>
    %c24_152 = arith.constant 24 : index
    %c0_153 = arith.constant 0 : index
    %111 = vector.load %arg7[%c24_152, %c0_153] : memref<72x324xf32, #tpu.memory_space<vmem>>, vector<8x324xf32>
    tpu.vector_store %arg7[%c24_152, %c0_153], %110 {strides = array<i32>} : memref<72x324xf32, #tpu.memory_space<vmem>>, vector<8x324xf32>,
    %c0_154 = arith.constant 0 : index
    %c19_155 = arith.constant 19 : index
    %112 = vector.load %arg5[%c0_154, %c19_155] : memref<8x362xf32, #tpu.memory_space<vmem>>, vector<8x324xf32>
    %c32_156 = arith.constant 32 : index
    %c0_157 = arith.constant 0 : index
    %113 = vector.load %arg7[%c32_156, %c0_157] : memref<72x324xf32, #tpu.memory_space<vmem>>, vector<8x324xf32>
    tpu.vector_store %arg7[%c32_156, %c0_157], %112 {strides = array<i32>} : memref<72x324xf32, #tpu.memory_space<vmem>>, vector<8x324xf32>,
    %c0_158 = arith.constant 0 : index
    %c20_159 = arith.constant 20 : index
    %114 = vector.load %arg5[%c0_158, %c20_159] : memref<8x362xf32, #tpu.memory_space<vmem>>, vector<8x324xf32>
    %c40_160 = arith.constant 40 : index
    %c0_161 = arith.constant 0 : index
    %115 = vector.load %arg7[%c40_160, %c0_161] : memref<72x324xf32, #tpu.memory_space<vmem>>, vector<8x324xf32>
    tpu.vector_store %arg7[%c40_160, %c0_161], %114 {strides = array<i32>} : memref<72x324xf32, #tpu.memory_space<vmem>>, vector<8x324xf32>,
    %c0_162 = arith.constant 0 : index
    %c36_163 = arith.constant 36 : index
    %116 = vector.load %arg5[%c0_162, %c36_163] : memref<8x362xf32, #tpu.memory_space<vmem>>, vector<8x324xf32>
    %c48_164 = arith.constant 48 : index
    %c0_165 = arith.constant 0 : index
    %117 = vector.load %arg7[%c48_164, %c0_165] : memref<72x324xf32, #tpu.memory_space<vmem>>, vector<8x324xf32>
    tpu.vector_store %arg7[%c48_164, %c0_165], %116 {strides = array<i32>} : memref<72x324xf32, #tpu.memory_space<vmem>>, vector<8x324xf32>,
    %c0_166 = arith.constant 0 : index
    %c37_167 = arith.constant 37 : index
    %118 = vector.load %arg5[%c0_166, %c37_167] : memref<8x362xf32, #tpu.memory_space<vmem>>, vector<8x324xf32>
    %c56_168 = arith.constant 56 : index
    %c0_169 = arith.constant 0 : index
    %119 = vector.load %arg7[%c56_168, %c0_169] : memref<72x324xf32, #tpu.memory_space<vmem>>, vector<8x324xf32>
    tpu.vector_store %arg7[%c56_168, %c0_169], %118 {strides = array<i32>} : memref<72x324xf32, #tpu.memory_space<vmem>>, vector<8x324xf32>,
    %c0_170 = arith.constant 0 : index
    %c38_171 = arith.constant 38 : index
    %120 = vector.load %arg5[%c0_170, %c38_171] : memref<8x362xf32, #tpu.memory_space<vmem>>, vector<8x324xf32>
    %c64_172 = arith.constant 64 : index
    %c0_173 = arith.constant 0 : index
    %121 = vector.load %arg7[%c64_172, %c0_173] : memref<72x324xf32, #tpu.memory_space<vmem>>, vector<8x324xf32>
    tpu.vector_store %arg7[%c64_172, %c0_173], %120 {strides = array<i32>} : memref<72x324xf32, #tpu.memory_space<vmem>>, vector<8x324xf32>,
    %c3 = arith.constant 3 : index
    %c0_174 = arith.constant 0 : index
    %c0_175 = arith.constant 0 : index
    %122 = vector.load %arg1[%c3, %c0_174, %c0_175] : memref<6x8x72xf32, #tpu.memory_space<vmem>>, vector<1x8x72xf32>
    %123 = vector.shape_cast %122 : vector<1x8x72xf32> to vector<8x72xf32>
    %c0_176 = arith.constant 0 : index
    %c0_177 = arith.constant 0 : index
    %124 = vector.load %arg7[%c0_176, %c0_177] : memref<72x324xf32, #tpu.memory_space<vmem>>, vector<72x324xf32>
    %cst_178 = arith.constant dense<0.000000e+00> : vector<8x324xf32>
    %125 = tpu.matmul %123, %124, %cst_178 {dimension_numbers = #tpu.dot_dimension_numbers<[1], [0], [0], [1], [0, 0, 1, 1], [], []>} : vector<8x72xf32>, vector<72x324xf32>, vector<8x324xf32> -> vector<8x324xf32>
    %c3_179 = arith.constant 3 : index
    %c0_180 = arith.constant 0 : index
    %c0_181 = arith.constant 0 : index
    %126 = vector.load %arg2[%c3_179, %c0_180, %c0_181] : memref<6x8x1xf32, #tpu.memory_space<vmem>>, vector<1x8x1xf32>
    %127 = vector.shape_cast %126 : vector<1x8x1xf32> to vector<8x1xf32>
    %128 = vector.broadcast %127 : vector<8x1xf32> to vector<8x324xf32>
    %129 = arith.addf %125, %128 : vector<8x324xf32>
    %cst_182 = arith.constant 0.000000e+00 : f32
    %130 = vector.broadcast %cst_182 : f32 to vector<8x324xf32>
    %131 = arith.maximumf %129, %130 : vector<8x324xf32>
    %cst_183 = arith.constant 0.000000e+00 : f32
    %132 = vector.shape_cast %6 : vector<1x324xi1> to vector<1x324xi1>
    %133 = vector.broadcast %132 : vector<1x324xi1> to vector<8x324xi1>
    %134 = vector.broadcast %cst_183 : f32 to vector<8x324xf32>
    %135 = arith.select %133, %131, %134 : vector<8x324xi1>, vector<8x324xf32>
    %c0_184 = arith.constant 0 : index
    %c19_185 = arith.constant 19 : index
    %136 = vector.load %arg6[%c0_184, %c19_185] : memref<8x362xf32, #tpu.memory_space<vmem>>, vector<8x324xf32>
    tpu.vector_store %arg6[%c0_184, %c19_185], %135 {strides = array<i32>} : memref<8x362xf32, #tpu.memory_space<vmem>>, vector<8x324xf32>,
    %c0_186 = arith.constant 0 : index
    %c0_187 = arith.constant 0 : index
    %137 = vector.load %arg6[%c0_186, %c0_187] : memref<8x362xf32, #tpu.memory_space<vmem>>, vector<8x324xf32>
    %c0_188 = arith.constant 0 : index
    %c0_189 = arith.constant 0 : index
    %138 = vector.load %arg7[%c0_188, %c0_189] : memref<72x324xf32, #tpu.memory_space<vmem>>, vector<8x324xf32>
    tpu.vector_store %arg7[%c0_188, %c0_189], %137 {strides = array<i32>} : memref<72x324xf32, #tpu.memory_space<vmem>>, vector<8x324xf32>,
    %c0_190 = arith.constant 0 : index
    %c1_191 = arith.constant 1 : index
    %139 = vector.load %arg6[%c0_190, %c1_191] : memref<8x362xf32, #tpu.memory_space<vmem>>, vector<8x324xf32>
    %c8_192 = arith.constant 8 : index
    %c0_193 = arith.constant 0 : index
    %140 = vector.load %arg7[%c8_192, %c0_193] : memref<72x324xf32, #tpu.memory_space<vmem>>, vector<8x324xf32>
    tpu.vector_store %arg7[%c8_192, %c0_193], %139 {strides = array<i32>} : memref<72x324xf32, #tpu.memory_space<vmem>>, vector<8x324xf32>,
    %c0_194 = arith.constant 0 : index
    %c2_195 = arith.constant 2 : index
    %141 = vector.load %arg6[%c0_194, %c2_195] : memref<8x362xf32, #tpu.memory_space<vmem>>, vector<8x324xf32>
    %c16_196 = arith.constant 16 : index
    %c0_197 = arith.constant 0 : index
    %142 = vector.load %arg7[%c16_196, %c0_197] : memref<72x324xf32, #tpu.memory_space<vmem>>, vector<8x324xf32>
    tpu.vector_store %arg7[%c16_196, %c0_197], %141 {strides = array<i32>} : memref<72x324xf32, #tpu.memory_space<vmem>>, vector<8x324xf32>,
    %c0_198 = arith.constant 0 : index
    %c18_199 = arith.constant 18 : index
    %143 = vector.load %arg6[%c0_198, %c18_199] : memref<8x362xf32, #tpu.memory_space<vmem>>, vector<8x324xf32>
    %c24_200 = arith.constant 24 : index
    %c0_201 = arith.constant 0 : index
    %144 = vector.load %arg7[%c24_200, %c0_201] : memref<72x324xf32, #tpu.memory_space<vmem>>, vector<8x324xf32>
    tpu.vector_store %arg7[%c24_200, %c0_201], %143 {strides = array<i32>} : memref<72x324xf32, #tpu.memory_space<vmem>>, vector<8x324xf32>,
    %c0_202 = arith.constant 0 : index
    %c19_203 = arith.constant 19 : index
    %145 = vector.load %arg6[%c0_202, %c19_203] : memref<8x362xf32, #tpu.memory_space<vmem>>, vector<8x324xf32>
    %c32_204 = arith.constant 32 : index
    %c0_205 = arith.constant 0 : index
    %146 = vector.load %arg7[%c32_204, %c0_205] : memref<72x324xf32, #tpu.memory_space<vmem>>, vector<8x324xf32>
    tpu.vector_store %arg7[%c32_204, %c0_205], %145 {strides = array<i32>} : memref<72x324xf32, #tpu.memory_space<vmem>>, vector<8x324xf32>,
    %c0_206 = arith.constant 0 : index
    %c20_207 = arith.constant 20 : index
    %147 = vector.load %arg6[%c0_206, %c20_207] : memref<8x362xf32, #tpu.memory_space<vmem>>, vector<8x324xf32>
    %c40_208 = arith.constant 40 : index
    %c0_209 = arith.constant 0 : index
    %148 = vector.load %arg7[%c40_208, %c0_209] : memref<72x324xf32, #tpu.memory_space<vmem>>, vector<8x324xf32>
    tpu.vector_store %arg7[%c40_208, %c0_209], %147 {strides = array<i32>} : memref<72x324xf32, #tpu.memory_space<vmem>>, vector<8x324xf32>,
    %c0_210 = arith.constant 0 : index
    %c36_211 = arith.constant 36 : index
    %149 = vector.load %arg6[%c0_210, %c36_211] : memref<8x362xf32, #tpu.memory_space<vmem>>, vector<8x324xf32>
    %c48_212 = arith.constant 48 : index
    %c0_213 = arith.constant 0 : index
    %150 = vector.load %arg7[%c48_212, %c0_213] : memref<72x324xf32, #tpu.memory_space<vmem>>, vector<8x324xf32>
    tpu.vector_store %arg7[%c48_212, %c0_213], %149 {strides = array<i32>} : memref<72x324xf32, #tpu.memory_space<vmem>>, vector<8x324xf32>,
    %c0_214 = arith.constant 0 : index
    %c37_215 = arith.constant 37 : index
    %151 = vector.load %arg6[%c0_214, %c37_215] : memref<8x362xf32, #tpu.memory_space<vmem>>, vector<8x324xf32>
    %c56_216 = arith.constant 56 : index
    %c0_217 = arith.constant 0 : index
    %152 = vector.load %arg7[%c56_216, %c0_217] : memref<72x324xf32, #tpu.memory_space<vmem>>, vector<8x324xf32>
    tpu.vector_store %arg7[%c56_216, %c0_217], %151 {strides = array<i32>} : memref<72x324xf32, #tpu.memory_space<vmem>>, vector<8x324xf32>,
    %c0_218 = arith.constant 0 : index
    %c38_219 = arith.constant 38 : index
    %153 = vector.load %arg6[%c0_218, %c38_219] : memref<8x362xf32, #tpu.memory_space<vmem>>, vector<8x324xf32>
    %c64_220 = arith.constant 64 : index
    %c0_221 = arith.constant 0 : index
    %154 = vector.load %arg7[%c64_220, %c0_221] : memref<72x324xf32, #tpu.memory_space<vmem>>, vector<8x324xf32>
    tpu.vector_store %arg7[%c64_220, %c0_221], %153 {strides = array<i32>} : memref<72x324xf32, #tpu.memory_space<vmem>>, vector<8x324xf32>,
    %c4 = arith.constant 4 : index
    %c0_222 = arith.constant 0 : index
    %c0_223 = arith.constant 0 : index
    %155 = vector.load %arg1[%c4, %c0_222, %c0_223] : memref<6x8x72xf32, #tpu.memory_space<vmem>>, vector<1x8x72xf32>
    %156 = vector.shape_cast %155 : vector<1x8x72xf32> to vector<8x72xf32>
    %c0_224 = arith.constant 0 : index
    %c0_225 = arith.constant 0 : index
    %157 = vector.load %arg7[%c0_224, %c0_225] : memref<72x324xf32, #tpu.memory_space<vmem>>, vector<72x324xf32>
    %cst_226 = arith.constant dense<0.000000e+00> : vector<8x324xf32>
    %158 = tpu.matmul %156, %157, %cst_226 {dimension_numbers = #tpu.dot_dimension_numbers<[1], [0], [0], [1], [0, 0, 1, 1], [], []>} : vector<8x72xf32>, vector<72x324xf32>, vector<8x324xf32> -> vector<8x324xf32>
    %c4_227 = arith.constant 4 : index
    %c0_228 = arith.constant 0 : index
    %c0_229 = arith.constant 0 : index
    %159 = vector.load %arg2[%c4_227, %c0_228, %c0_229] : memref<6x8x1xf32, #tpu.memory_space<vmem>>, vector<1x8x1xf32>
    %160 = vector.shape_cast %159 : vector<1x8x1xf32> to vector<8x1xf32>
    %161 = vector.broadcast %160 : vector<8x1xf32> to vector<8x324xf32>
    %162 = arith.addf %158, %161 : vector<8x324xf32>
    %c0_230 = arith.constant 0 : index
    %c19_231 = arith.constant 19 : index
    %163 = vector.load %arg5[%c0_230, %c19_231] : memref<8x362xf32, #tpu.memory_space<vmem>>, vector<8x324xf32>
    %164 = arith.addf %162, %163 : vector<8x324xf32>
    %cst_232 = arith.constant 0.000000e+00 : f32
    %165 = vector.shape_cast %6 : vector<1x324xi1> to vector<1x324xi1>
    %166 = vector.broadcast %165 : vector<1x324xi1> to vector<8x324xi1>
    %167 = vector.broadcast %cst_232 : f32 to vector<8x324xf32>
    %168 = arith.select %166, %164, %167 : vector<8x324xi1>, vector<8x324xf32>
    %c0_233 = arith.constant 0 : index
    %c19_234 = arith.constant 19 : index
    %169 = vector.load %arg5[%c0_233, %c19_234] : memref<8x362xf32, #tpu.memory_space<vmem>>, vector<8x324xf32>
    tpu.vector_store %arg5[%c0_233, %c19_234], %168 {strides = array<i32>} : memref<8x362xf32, #tpu.memory_space<vmem>>, vector<8x324xf32>,
    %c0_235 = arith.constant 0 : index
    %c0_236 = arith.constant 0 : index
    %170 = vector.load %arg5[%c0_235, %c0_236] : memref<8x362xf32, #tpu.memory_space<vmem>>, vector<8x324xf32>
    %c0_237 = arith.constant 0 : index
    %c0_238 = arith.constant 0 : index
    %171 = vector.load %arg7[%c0_237, %c0_238] : memref<72x324xf32, #tpu.memory_space<vmem>>, vector<8x324xf32>
    tpu.vector_store %arg7[%c0_237, %c0_238], %170 {strides = array<i32>} : memref<72x324xf32, #tpu.memory_space<vmem>>, vector<8x324xf32>,
    %c0_239 = arith.constant 0 : index
    %c1_240 = arith.constant 1 : index
    %172 = vector.load %arg5[%c0_239, %c1_240] : memref<8x362xf32, #tpu.memory_space<vmem>>, vector<8x324xf32>
    %c8_241 = arith.constant 8 : index
    %c0_242 = arith.constant 0 : index
    %173 = vector.load %arg7[%c8_241, %c0_242] : memref<72x324xf32, #tpu.memory_space<vmem>>, vector<8x324xf32>
    tpu.vector_store %arg7[%c8_241, %c0_242], %172 {strides = array<i32>} : memref<72x324xf32, #tpu.memory_space<vmem>>, vector<8x324xf32>,
    %c0_243 = arith.constant 0 : index
    %c2_244 = arith.constant 2 : index
    %174 = vector.load %arg5[%c0_243, %c2_244] : memref<8x362xf32, #tpu.memory_space<vmem>>, vector<8x324xf32>
    %c16_245 = arith.constant 16 : index
    %c0_246 = arith.constant 0 : index
    %175 = vector.load %arg7[%c16_245, %c0_246] : memref<72x324xf32, #tpu.memory_space<vmem>>, vector<8x324xf32>
    tpu.vector_store %arg7[%c16_245, %c0_246], %174 {strides = array<i32>} : memref<72x324xf32, #tpu.memory_space<vmem>>, vector<8x324xf32>,
    %c0_247 = arith.constant 0 : index
    %c18_248 = arith.constant 18 : index
    %176 = vector.load %arg5[%c0_247, %c18_248] : memref<8x362xf32, #tpu.memory_space<vmem>>, vector<8x324xf32>
    %c24_249 = arith.constant 24 : index
    %c0_250 = arith.constant 0 : index
    %177 = vector.load %arg7[%c24_249, %c0_250] : memref<72x324xf32, #tpu.memory_space<vmem>>, vector<8x324xf32>
    tpu.vector_store %arg7[%c24_249, %c0_250], %176 {strides = array<i32>} : memref<72x324xf32, #tpu.memory_space<vmem>>, vector<8x324xf32>,
    %c0_251 = arith.constant 0 : index
    %c19_252 = arith.constant 19 : index
    %178 = vector.load %arg5[%c0_251, %c19_252] : memref<8x362xf32, #tpu.memory_space<vmem>>, vector<8x324xf32>
    %c32_253 = arith.constant 32 : index
    %c0_254 = arith.constant 0 : index
    %179 = vector.load %arg7[%c32_253, %c0_254] : memref<72x324xf32, #tpu.memory_space<vmem>>, vector<8x324xf32>
    tpu.vector_store %arg7[%c32_253, %c0_254], %178 {strides = array<i32>} : memref<72x324xf32, #tpu.memory_space<vmem>>, vector<8x324xf32>,
    %c0_255 = arith.constant 0 : index
    %c20_256 = arith.constant 20 : index
    %180 = vector.load %arg5[%c0_255, %c20_256] : memref<8x362xf32, #tpu.memory_space<vmem>>, vector<8x324xf32>
    %c40_257 = arith.constant 40 : index
    %c0_258 = arith.constant 0 : index
    %181 = vector.load %arg7[%c40_257, %c0_258] : memref<72x324xf32, #tpu.memory_space<vmem>>, vector<8x324xf32>
    tpu.vector_store %arg7[%c40_257, %c0_258], %180 {strides = array<i32>} : memref<72x324xf32, #tpu.memory_space<vmem>>, vector<8x324xf32>,
    %c0_259 = arith.constant 0 : index
    %c36_260 = arith.constant 36 : index
    %182 = vector.load %arg5[%c0_259, %c36_260] : memref<8x362xf32, #tpu.memory_space<vmem>>, vector<8x324xf32>
    %c48_261 = arith.constant 48 : index
    %c0_262 = arith.constant 0 : index
    %183 = vector.load %arg7[%c48_261, %c0_262] : memref<72x324xf32, #tpu.memory_space<vmem>>, vector<8x324xf32>
    tpu.vector_store %arg7[%c48_261, %c0_262], %182 {strides = array<i32>} : memref<72x324xf32, #tpu.memory_space<vmem>>, vector<8x324xf32>,
    %c0_263 = arith.constant 0 : index
    %c37_264 = arith.constant 37 : index
    %184 = vector.load %arg5[%c0_263, %c37_264] : memref<8x362xf32, #tpu.memory_space<vmem>>, vector<8x324xf32>
    %c56_265 = arith.constant 56 : index
    %c0_266 = arith.constant 0 : index
    %185 = vector.load %arg7[%c56_265, %c0_266] : memref<72x324xf32, #tpu.memory_space<vmem>>, vector<8x324xf32>
    tpu.vector_store %arg7[%c56_265, %c0_266], %184 {strides = array<i32>} : memref<72x324xf32, #tpu.memory_space<vmem>>, vector<8x324xf32>,
    %c0_267 = arith.constant 0 : index
    %c38_268 = arith.constant 38 : index
    %186 = vector.load %arg5[%c0_267, %c38_268] : memref<8x362xf32, #tpu.memory_space<vmem>>, vector<8x324xf32>
    %c64_269 = arith.constant 64 : index
    %c0_270 = arith.constant 0 : index
    %187 = vector.load %arg7[%c64_269, %c0_270] : memref<72x324xf32, #tpu.memory_space<vmem>>, vector<8x324xf32>
    tpu.vector_store %arg7[%c64_269, %c0_270], %186 {strides = array<i32>} : memref<72x324xf32, #tpu.memory_space<vmem>>, vector<8x324xf32>,
    %c5 = arith.constant 5 : index
    %c0_271 = arith.constant 0 : index
    %c0_272 = arith.constant 0 : index
    %188 = vector.load %arg1[%c5, %c0_271, %c0_272] : memref<6x8x72xf32, #tpu.memory_space<vmem>>, vector<1x8x72xf32>
    %189 = vector.shape_cast %188 : vector<1x8x72xf32> to vector<8x72xf32>
    %c0_273 = arith.constant 0 : index
    %c0_274 = arith.constant 0 : index
    %190 = vector.load %arg7[%c0_273, %c0_274] : memref<72x324xf32, #tpu.memory_space<vmem>>, vector<72x324xf32>
    %cst_275 = arith.constant dense<0.000000e+00> : vector<8x324xf32>
    %191 = tpu.matmul %189, %190, %cst_275 {dimension_numbers = #tpu.dot_dimension_numbers<[1], [0], [0], [1], [0, 0, 1, 1], [], []>} : vector<8x72xf32>, vector<72x324xf32>, vector<8x324xf32> -> vector<8x324xf32>
    %c5_276 = arith.constant 5 : index
    %c0_277 = arith.constant 0 : index
    %c0_278 = arith.constant 0 : index
    %192 = vector.load %arg2[%c5_276, %c0_277, %c0_278] : memref<6x8x1xf32, #tpu.memory_space<vmem>>, vector<1x8x1xf32>
    %193 = vector.shape_cast %192 : vector<1x8x1xf32> to vector<8x1xf32>
    %194 = vector.broadcast %193 : vector<8x1xf32> to vector<8x324xf32>
    %195 = arith.addf %191, %194 : vector<8x324xf32>
    %cst_279 = arith.constant 0.000000e+00 : f32
    %196 = vector.shape_cast %6 : vector<1x324xi1> to vector<1x324xi1>
    %197 = vector.broadcast %196 : vector<1x324xi1> to vector<8x324xi1>
    %198 = vector.broadcast %cst_279 : f32 to vector<8x324xf32>
    %199 = arith.select %197, %195, %198 : vector<8x324xi1>, vector<8x324xf32>
    %200 = vector.extract_strided_slice %199 {offsets = [0, 0], sizes = [1, 324], strides = [1, 1]} : vector<8x324xf32> to vector<1x324xf32>
    %c0_280 = arith.constant 0 : index
    %c0_281 = arith.constant 0 : index
    %201 = vector.load %arg4[%c0_280, %c0_281] : memref<1x324xf32, #tpu.memory_space<vmem>>, vector<1x324xf32>
    tpu.vector_store %arg4[%c0_280, %c0_281], %200 {strides = array<i32>} : memref<1x324xf32, #tpu.memory_space<vmem>>, vector<1x324xf32>,
    return
  }
}

</mosaic_0001>

<bundles_post_ra>
// kernel: tpu_custom_call.1
= control target key start
LH: loop header
LB: loop body
LE: loop exit
PB: predicated region body
PF: predicated region fallthrough
CT: control target
= control target key end

     0   :  { %9 = vsyncpa [#allocation6], 0  ;;  %s2574_s0 = inlined_call_operand.hbm [shape: f32[8,362], index: 0, kind: input, shape index: {}]   ;;  %s2575_s1 = inlined_call_operand.vmem [shape: f32[6,8,72], index: 1, kind: input, shape index: {}]   ;;  %s2576_s2 = inlined_call_operand.vmem [shape: f32[6,8,1], index: 2, kind: input, shape index: {}]   ;;  %s2577_s3 = inlined_call_operand.vmem [shape: f32[1,324], index: 3, kind: input, shape index: {}]   ;;  %s2578_s4 = inlined_call_operand.hbm [shape: f32[1,324], index: 4, kind: output, shape index: {}]  }
   0x1   :  { %10 = vsyncpa [#allocation7], 0  ;;  %s16_s17 = sshll.u32 %s2574_s0, 4  ;;  %s1926_s18 = smov [#allocation5]   ;;  %s17_s17 = int_to_ptr.hbm [resolvable:$true] %s16_s17 }
   0x2   :  { %s18_s19 = sshll.u32 %s1926_s18, 4  ;;  %s19_s19 = int_to_ptr.vmem [resolvable:$true] %s18_s19 }
   0x3   :  { %21 = dma.hbm_to_vmem [thread:$0]  %s17_s17, 384, %s19_s19, [#allocation6]  }
   0x4   :  { %1922 = dma.done.wait [#allocation6], 384  }
   0x5   :  { %1923 = vsyncadd [#allocation6], 4294966912  ;;  %v197_v0 = vld [vmem:[#allocation5 + $0x10] sm:$0xff]  ;;  %v1967_v1 = vld [vmem:[#allocation5] sm:$0xff]  ;;  %s1927_s20 = smov 90   ;;  %s1928_s21 = smov 91  }
   0x6   :  { %205 = vrot.lane.b32.xlu1 %v197_v0, %s1927_s20  ;;  %201 = vrot.lane.b32.xlu0 %v1967_v1, %s1927_s20  ;;  %v1972_v2 = vld [vmem:[#allocation5 + $0x8] sm:$0xff]  ;;  %s1929_s0 = smov 92   ;;  %s1930_s22 = smov 108   ;;  %vm46_vm0 = vcmask 556032   ;;  %vm207_vm1 = vcmask 736256   ;;  %vm186_vm2 = vcmask 744448  }
   0x7   :  { %182 = vrot.lane.b32.xlu2 %v1972_v2, %s1928_s21  ;;  %s1931_s23 = smov 109   ;;  %s1932_s24 = smov 110   ;;  %47 = vst.msk [vmem:[#allocation4 + $0x10] sm:$0xff] %vm46_vm0, %v197_v0  ;;  %vm165_vm3 = vcmask 752640   ;;  %vm2581_vm4 = vcmask 883712   ;;  %v244_v32 = vld [vmem:[%s2576_s2] sm:$0xff] }
   0x8   :  { %s1933_s25 = smov 126   ;;  %s1934_s26 = smov 127   ;;  %vm123_vm5 = vcmask 891904   ;;  %v1935_v33 = vmov 0   ;;  %vm2580_vm6 = vcmask 900096   ;;  %v216_v46 = vld [vmem:[%s2575_s1] sm:$0xff] }
   0x9   :  { %1871 = vset.pattern.permute.xlu0 %v1935_v33  ;;  %1872 = vset.pattern.permute.xlu2 %v1935_v33  ;;  %vm2579_vm7 = vcmask 588800   ;;  %vm81_vm8 = vcmask 1031168   ;;  %vm60_vm9 = vcmask 1039360   ;;  %v39_v55 = vld [vmem:[%s2577_s3] sm:$0x7]  ;;  %s1936_s3 = smov 19  }
   0xa   :  { %1873 = vset.pattern.permute.xlu1 %v1935_v33  ;;  %vm40_vm10 = vcmp.gt.f32.partialorder %v39_v55, 0.5  ;;  %vm34_vm14 = vcmask 867328   ;;  %vm339_vm15 = vcmask 1047704  }
   0xb   :  { %v314_v56 = vsel %vm40_vm10, 1, %v1935_v33  ;;  %vm342_vm10 = vcmask 711680  }
   0xc   :  { %v315_v57 = vperm.slane %v314_v56, 0  ;;  %v316_v58 = vperm.slane %v314_v56, 1 }
   0xe   :  { %203 = vrot.lane.b32.xlu0 %v1972_v2, %s1927_s20  ;;  %180 = vrot.lane.b32.xlu1 %v1967_v1, %s1928_s21  ;;  %v219_v45 = vld [vmem:[#allocation4 + $0x10] sm:$0xff]  ;;  %vm2050_vm11 = vcmp.eq.s32.totalorder %v315_v57, 1  ;;  %vm2054_vm12 = vcmp.eq.s32.totalorder %v316_v58, 1  ;;  %v1833_v58 = vld [vmem:[%s2575_s1 + $0x8] sm:$0xff] }
   0xf   :  { %184 = vrot.lane.b32.xlu2 %v197_v0, %s1928_s21 }
  0x16   :  { %161 = vrot.lane.b32.xlu1 %v1972_v2, %s1929_s0  ;;  %159 = vrot.lane.b32.xlu0 %v1967_v1, %s1929_s0 }
  0x17   :  { %163 = vrot.lane.b32.xlu2 %v197_v0, %s1929_s0 }
  0x1e   :  { %140 = vrot.lane.b32.xlu1 %v1972_v2, %s1930_s22  ;;  %138 = vrot.lane.b32.xlu0 %v1967_v1, %s1930_s22 }
  0x1f   :  { %142 = vrot.lane.b32.xlu2 %v197_v0, %s1930_s22 }
  0x26   :  { %119 = vrot.lane.b32.xlu1 %v1972_v2, %s1931_s23  ;;  %117 = vrot.lane.b32.xlu0 %v1967_v1, %s1931_s23 }
  0x27   :  { %121 = vrot.lane.b32.xlu2 %v197_v0, %s1931_s23 }
  0x2e   :  { %98 = vrot.lane.b32.xlu1 %v1972_v2, %s1932_s24  ;;  %96 = vrot.lane.b32.xlu0 %v1967_v1, %s1932_s24 }
  0x2f   :  { %100 = vrot.lane.b32.xlu2 %v197_v0, %s1932_s24 }
  0x36   :  { %77 = vrot.lane.b32.xlu1 %v1972_v2, %s1933_s25  ;;  %75 = vrot.lane.b32.xlu0 %v1967_v1, %s1933_s25 }
  0x37   :  { %79 = vrot.lane.b32.xlu2 %v197_v0, %s1933_s25 }
  0x3e   :  { %56 = vrot.lane.b32.xlu1 %v1972_v2, %s1934_s26  ;;  %54 = vrot.lane.b32.xlu0 %v1967_v1, %s1934_s26 }
  0x3f   :  { %58 = vrot.lane.b32.xlu2 %v197_v0, %s1934_s26 }
  0x46   :  { %247 = vperm.xlu0 %1871, %v244_v32  }
  0x61   :  { %v183_v3 = vpop.permute.xlu2 %182 }
  0x69   :  { %v185_v4 = vpop.permute.xlu2 %184 }
  0x6a   :  { %194 = vst.msk [vmem:[#allocation4 + $0xb8] sm:$0xff] %vm46_vm0, %v185_v4  ;;  %v188_v17 = vsel %vm186_vm2, %v183_v3, %v185_v4  ;;  %v317_v4 = vperm.slane %v314_v56, 2 }
  0x6c   :  { %vm2064_vm13 = vcmp.eq.s32.totalorder %v317_v4, 1 }
  0x71   :  { %v164_v5 = vpop.permute.xlu2 %163  ;;  %v240_v12 = vld [vmem:[#allocation4 + $0xb8] sm:$0xff] }
  0x72   :  { %173 = vst.msk [vmem:[#allocation4 + $0xa0] sm:$0xff] %vm46_vm0, %v164_v5 }
  0x78   :  { %v206_v6 = vpop.permute.xlu1 %205  ;;  %v202_v7 = vpop.permute.xlu0 %201 }
  0x79   :  { %215 = vst.msk [vmem:[#allocation4 + $0xd0] sm:$0xff] %vm46_vm0, %v206_v6  ;;  %v143_v8 = vpop.permute.xlu2 %142  ;;  %v237_v16 = vld [vmem:[#allocation4 + $0xa0] sm:$0xff] }
  0x7a   :  { %152 = vst.msk [vmem:[#allocation4 + $0x88] sm:$0xff] %vm46_vm0, %v143_v8 }
  0x80   :  { %v204_v9 = vpop.permute.xlu0 %203  ;;  %v181_v10 = vpop.permute.xlu1 %180  ;;  %v243_v11 = vld [vmem:[#allocation4 + $0xd0] sm:$0xff] }
  0x81   :  { %v208_v13 = vsel %vm207_vm1, %v202_v7, %v204_v9  ;;  %v209_v14 = vsel %vm207_vm1, %v204_v9, %v206_v6  ;;  %301 = vmatpush.msra.mxu2 %v243_v11  ;;  %v122_v15 = vpop.permute.xlu2 %121  ;;  %v187_v18 = vsel %vm186_vm2, %v181_v10, %v183_v3  ;;  %v234_v19 = vld [vmem:[#allocation4 + $0x88] sm:$0xff]  ;;  %v1937_v9 = vmov 0.0  }
  0x82   :  { %261 = vmatpush.msra.mxu0 %v208_v13  ;;  %281 = vmatpush.msra.mxu1 %v209_v14  ;;  %131 = vst.msk [vmem:[#allocation4 + $0x70] sm:$0xff] %vm46_vm0, %v122_v15 }
  0x83   :  { %302 = vmatpush.msra.mxu2 %v240_v12  ;;  %32 = vst [vmem:[#allocation2] sm:$0xff] %v1937_v9 }
  0x84   :  { %262 = vmatpush.msra.mxu0 %v187_v18  ;;  %282 = vmatpush.msra.mxu1 %v188_v17  ;;  %36 = vst [vmem:[#allocation3] sm:$0xff] %v1937_v9 }
  0x85   :  { %303 = vmatpush.msra.mxu2 %v237_v16  ;;  %35 = vst.msk [vmem:[#allocation2 + $0x10] sm:$0xff] %vm34_vm14, %v1937_v9 }
  0x86   :  { %38 = vst.msk [vmem:[#allocation3 + $0x10] sm:$0xff] %vm34_vm14, %v1937_v9  ;;  %vm2588_vm14 = vcmask 588800  }
  0x87   :  { %304 = vmatpush.msra.mxu2 %v234_v19 }
  0x88   :  { %v162_v20 = vpop.permute.xlu1 %161  ;;  %v160_v21 = vpop.permute.xlu0 %159 }
  0x89   :  { %v167_v22 = vsel %vm165_vm3, %v162_v20, %v164_v5  ;;  %v166_v23 = vsel %vm165_vm3, %v160_v21, %v162_v20  ;;  %v101_v24 = vpop.permute.xlu2 %100  ;;  %v231_v25 = vld [vmem:[#allocation4 + $0x70] sm:$0xff] }
  0x8a   :  { %263 = vmatpush.msra.mxu0 %v166_v23  ;;  %283 = vmatpush.msra.mxu1 %v167_v22  ;;  %110 = vst.msk [vmem:[#allocation4 + $0x58] sm:$0xff] %vm46_vm0, %v101_v24 }
  0x8b   :  { %305 = vmatpush.msra.mxu2 %v231_v25 }
  0x90   :  { %v141_v26 = vpop.permute.xlu1 %140  ;;  %v139_v27 = vpop.permute.xlu0 %138 }
  0x91   :  { %v146_v28 = vsel %vm2581_vm4, %v141_v26, %v143_v8  ;;  %v145_v29 = vsel %vm2581_vm4, %v139_v27, %v141_v26  ;;  %v80_v30 = vpop.permute.xlu2 %79  ;;  %v228_v31 = vld [vmem:[#allocation4 + $0x58] sm:$0xff] }
  0x92   :  { %264 = vmatpush.msra.mxu0 %v145_v29  ;;  %284 = vmatpush.msra.mxu1 %v146_v28  ;;  %89 = vst.msk [vmem:[#allocation4 + $0x40] sm:$0xff] %vm46_vm0, %v80_v30 }
  0x93   :  { %306 = vmatpush.msra.mxu2 %v228_v31 }
  0x98   :  { %v120_v34 = vpop.permute.xlu1 %119  ;;  %v118_v35 = vpop.permute.xlu0 %117 }
  0x99   :  { %v125_v36 = vsel %vm123_vm5, %v120_v34, %v122_v15  ;;  %v124_v37 = vsel %vm123_vm5, %v118_v35, %v120_v34  ;;  %v59_v38 = vpop.permute.xlu2 %58  ;;  %v225_v39 = vld [vmem:[#allocation4 + $0x40] sm:$0xff] }
  0x9a   :  { %265 = vmatpush.msra.mxu0 %v124_v37  ;;  %285 = vmatpush.msra.mxu1 %v125_v36  ;;  %68 = vst.msk [vmem:[#allocation4 + $0x28] sm:$0xff] %vm46_vm0, %v59_v38 }
  0x9b   :  { %307 = vmatpush.msra.mxu2 %v225_v39 }
  0xa0   :  { %v99_v40 = vpop.permute.xlu1 %98  ;;  %v97_v41 = vpop.permute.xlu0 %96 }
  0xa1   :  { %v104_v42 = vsel %vm2580_vm6, %v99_v40, %v101_v24  ;;  %v103_v43 = vsel %vm2580_vm6, %v97_v41, %v99_v40  ;;  %v222_v44 = vld [vmem:[#allocation4 + $0x28] sm:$0xff] }
  0xa2   :  { %266 = vmatpush.msra.mxu0 %v103_v43  ;;  %286 = vmatpush.msra.mxu1 %v104_v42 }
  0xa3   :  { %308 = vmatpush.msra.mxu2 %v222_v44 }
  0xa5   :  { %309 = vmatpush.msra.mxu2 %v219_v45 }
  0xa6   :  { %1832 = vmatmul.msk.f32.vlgmr.msra.gmra.mxu2 %vm2579_vm7, %v216_v46 }
  0xa8   :  { %v78_v47 = vpop.permute.xlu1 %77  ;;  %v76_v48 = vpop.permute.xlu0 %75 }
  0xa9   :  { %v83_v49 = vsel %vm81_vm8, %v78_v47, %v80_v30  ;;  %v82_v50 = vsel %vm81_vm8, %v76_v48, %v78_v47 }
  0xaa   :  { %267 = vmatpush.msra.mxu0 %v82_v50  ;;  %287 = vmatpush.msra.mxu1 %v83_v49 }
  0xb0   :  { %v57_v51 = vpop.permute.xlu1 %56  ;;  %v55_v52 = vpop.permute.xlu0 %54 }
  0xb1   :  { %v62_v53 = vsel %vm60_vm9, %v57_v51, %v59_v38  ;;  %v61_v54 = vsel %vm60_vm9, %v55_v52, %v57_v51 }
  0xb2   :  { %268 = vmatpush.msra.mxu0 %v61_v54  ;;  %288 = vmatpush.msra.mxu1 %v62_v53 }
  0xb4   :  { %269 = vmatpush.msra.mxu0 %v1967_v1  ;;  %289 = vmatpush.msra.mxu1 %v1972_v2 }
  0xb5   :  { %1830 = vmatmul.msk.f32.vlgmr.msra.gmra.mxu0 %vm2579_vm7, %v216_v46  ;;  %1831 = vmatmul.msk.f32.vlgmr.msra.gmra.mxu1 %vm2579_vm7, %v216_v46  ;;  %vm333_vm7 = vcmask 154624   ;;  %v1834_v46 = vld [vmem:[%s2576_s2 + $0x8] sm:$0xff] }
  0xb8   :  { %v248_v59 = vpop.permute.xlu0 %247 }
 0x129   :  { %v311_v5 = vpop.f32.mrf.mxu2 }
 0x12a   :  { %v312_v6 = vadd.f32 %v311_v5, %v248_v59 }
 0x12c   :  { %v323_v8 = vsel %vm2064_vm13, %v312_v6, 0.0 }
 0x132   :  { %v271_v62 = vpop.f32.mrf.mxu0  ;;  %v291_v63 = vpop.f32.mrf.mxu1 }
 0x133   :  { %v272_v0 = vadd.f32 %v271_v62, %v248_v59  ;;  %v292_v1 = vadd.f32 %v291_v63, %v248_v59 }
 0x135   :  { %v322_v2 = vsel %vm2054_vm12, %v292_v1, 0.0  ;;  %v321_v3 = vsel %vm2050_vm11, %v272_v0, 0.0 }
 0x136   :  { %329 = vrot.lane.b32.xlu2 %v322_v2, %s1936_s3  ;;  %327 = vrot.lane.b32.xlu1 %v321_v3, %s1936_s3 }
 0x13e   :  { %331 = vrot.lane.b32.xlu1 %v323_v8, %s1936_s3 }
 0x190   :  { %v330_v11 = vpop.permute.xlu2 %329 }
 0x1a8   :  { %v328_v10 = vpop.permute.xlu1 %327 }
 0x1a9   :  { %340 = vst.msk [vmem:[#allocation2] sm:$0xff] %vm339_vm15, %v328_v10  ;;  %v2083_v15 = vsel %vm333_vm7, %v328_v10, %v330_v11 }
 0x1b0   :  { %v2072_v12 = vld [vmem:[#allocation2] sm:$0xff]  ;;  %v332_v13 = vpop.permute.xlu1 %331 }
 0x1b1   :  { %v335_v14 = vsel %vm333_vm7, %v330_v11, %v332_v13  ;;  %496 = vrot.lane.b32.xlu2 %v2072_v12, %s1927_s20  ;;  %476 = vrot.lane.b32.xlu1 %v2072_v12, %s1928_s21 }
 0x1b2   :  { %343 = vst.msk [vmem:[#allocation2 + $0x10] sm:$0xff] %vm342_vm10, %v335_v14  ;;  %456 = vrot.lane.b32.xlu0 %v2072_v12, %s1929_s0 }
 0x1b9   :  { %v2085_v16 = vld [vmem:[#allocation2 + $0x10] sm:$0xff]  ;;  %458 = vrot.lane.b32.xlu1 %v2083_v15, %s1929_s0  ;;  %436 = vrot.lane.b32.xlu2 %v2072_v12, %s1930_s22 }
 0x1ba   :  { %349 = vst.msk [vmem:[#allocation4 + $0x10] sm:$0xff] %vm46_vm0, %v2085_v16  ;;  %498 = vrot.lane.b32.xlu0 %v2083_v15, %s1927_s20 }
 0x1c1   :  { %500 = vrot.lane.b32.xlu1 %v2085_v16, %s1927_s20  ;;  %416 = vrot.lane.b32.xlu2 %v2072_v12, %s1931_s23  ;;  %v514_v5 = vld [vmem:[#allocation4 + $0x10] sm:$0xff] }
 0x1c2   :  { %438 = vrot.lane.b32.xlu0 %v2083_v15, %s1930_s22 }
 0x1c9   :  { %480 = vrot.lane.b32.xlu1 %v2085_v16, %s1928_s21  ;;  %396 = vrot.lane.b32.xlu2 %v2072_v12, %s1932_s24 }
 0x1ca   :  { %418 = vrot.lane.b32.xlu0 %v2083_v15, %s1931_s23 }
 0x1d1   :  { %460 = vrot.lane.b32.xlu1 %v2085_v16, %s1929_s0  ;;  %376 = vrot.lane.b32.xlu2 %v2072_v12, %s1933_s25 }
 0x1d2   :  { %398 = vrot.lane.b32.xlu0 %v2083_v15, %s1932_s24 }
 0x1d9   :  { %440 = vrot.lane.b32.xlu1 %v2085_v16, %s1930_s22  ;;  %478 = vrot.lane.b32.xlu2 %v2083_v15, %s1928_s21 }
 0x1da   :  { %378 = vrot.lane.b32.xlu0 %v2083_v15, %s1933_s25 }
 0x1e1   :  { %420 = vrot.lane.b32.xlu1 %v2085_v16, %s1931_s23  ;;  %356 = vrot.lane.b32.xlu2 %v2072_v12, %s1934_s26 }
 0x1e2   :  { %358 = vrot.lane.b32.xlu0 %v2083_v15, %s1934_s26 }
 0x1e9   :  { %360 = vrot.lane.b32.xlu1 %v2085_v16, %s1934_s26  ;;  %400 = vrot.lane.b32.xlu2 %v2085_v16, %s1932_s24 }
 0x1ea   :  { %380 = vrot.lane.b32.xlu0 %v2085_v16, %s1933_s25 }
 0x1f1   :  { %543 = vperm.xlu2 %1872, %v1834_v46  }
 0x20b   :  { %v497_v17 = vpop.permute.xlu2 %496 }
 0x213   :  { %v437_v18 = vpop.permute.xlu2 %436 }
 0x21b   :  { %v417_v19 = vpop.permute.xlu2 %416 }
 0x223   :  { %v477_v20 = vpop.permute.xlu1 %476  ;;  %v397_v21 = vpop.permute.xlu2 %396 }
 0x224   :  { %v457_v22 = vpop.permute.xlu0 %456 }
 0x22b   :  { %v459_v23 = vpop.permute.xlu1 %458  ;;  %v377_v24 = vpop.permute.xlu2 %376 }
 0x22c   :  { %v499_v25 = vpop.permute.xlu0 %498  ;;  %v462_v32 = vsel %vm165_vm3, %v457_v22, %v459_v23 }
 0x22d   :  { %v502_v26 = vsel %vm207_vm1, %v497_v17, %v499_v25 }
 0x22e   :  { %556 = vmatpush.msra.mxu3 %v502_v26 }
 0x233   :  { %v501_v27 = vpop.permute.xlu1 %500  ;;  %v479_v28 = vpop.permute.xlu2 %478 }
 0x234   :  { %v503_v29 = vsel %vm207_vm1, %v499_v25, %v501_v27  ;;  %509 = vst.msk [vmem:[#allocation4 + $0xd0] sm:$0xff] %vm46_vm0, %v501_v27  ;;  %v439_v30 = vpop.permute.xlu0 %438  ;;  %v482_v31 = vsel %vm186_vm2, %v477_v20, %v479_v28 }
 0x235   :  { %557 = vmatpush.msra.mxu3 %v482_v31  ;;  %576 = vmatpush.msrb.mxu0 %v503_v29  ;;  %v442_v33 = vsel %vm2581_vm4, %v437_v18, %v439_v30 }
 0x237   :  { %558 = vmatpush.msra.mxu3 %v462_v32 }
 0x239   :  { %559 = vmatpush.msra.mxu3 %v442_v33 }
 0x23b   :  { %v481_v34 = vpop.permute.xlu1 %480  ;;  %v357_v35 = vpop.permute.xlu2 %356  ;;  %v538_v36 = vld [vmem:[#allocation4 + $0xd0] sm:$0xff] }
 0x23c   :  { %v483_v37 = vsel %vm186_vm2, %v479_v28, %v481_v34  ;;  %489 = vst.msk [vmem:[#allocation4 + $0xb8] sm:$0xff] %vm46_vm0, %v481_v34  ;;  %v419_v38 = vpop.permute.xlu0 %418  ;;  %596 = vmatpush.msrb.mxu1 %v538_v36 }
 0x23d   :  { %v422_v39 = vsel %vm123_vm5, %v417_v19, %v419_v38  ;;  %577 = vmatpush.msrb.mxu0 %v483_v37 }
 0x23e   :  { %560 = vmatpush.msra.mxu3 %v422_v39 }
 0x243   :  { %v461_v40 = vpop.permute.xlu1 %460  ;;  %v401_v41 = vpop.permute.xlu2 %400  ;;  %v535_v42 = vld [vmem:[#allocation4 + $0xb8] sm:$0xff] }
 0x244   :  { %v463_v43 = vsel %vm165_vm3, %v459_v23, %v461_v40  ;;  %469 = vst.msk [vmem:[#allocation4 + $0xa0] sm:$0xff] %vm46_vm0, %v461_v40  ;;  %v399_v44 = vpop.permute.xlu0 %398  ;;  %597 = vmatpush.msrb.mxu1 %v535_v42 }
 0x245   :  { %v402_v45 = vsel %vm2580_vm6, %v397_v21, %v399_v44  ;;  %409 = vst.msk [vmem:[#allocation4 + $0x58] sm:$0xff] %vm46_vm0, %v401_v41  ;;  %578 = vmatpush.msrb.mxu0 %v463_v43  ;;  %v403_v57 = vsel %vm2580_vm6, %v399_v44, %v401_v41  ;;  %vm2589_vm6 = vmmov %vm2588_vm14 }
 0x246   :  { %561 = vmatpush.msra.mxu3 %v402_v45 }
 0x24b   :  { %v441_v47 = vpop.permute.xlu1 %440  ;;  %v532_v48 = vld [vmem:[#allocation4 + $0xa0] sm:$0xff]  ;;  %v544_v6 = vpop.permute.xlu2 %543 }
 0x24c   :  { %v443_v49 = vsel %vm2581_vm4, %v439_v30, %v441_v47  ;;  %449 = vst.msk [vmem:[#allocation4 + $0x88] sm:$0xff] %vm46_vm0, %v441_v47  ;;  %v379_v50 = vpop.permute.xlu0 %378  ;;  %598 = vmatpush.msrb.mxu1 %v532_v48  ;;  %v523_v1 = vld [vmem:[#allocation4 + $0x58] sm:$0xff]  ;;  %v1839_v30 = vld [vmem:[%s2576_s2 + $0x10] sm:$0xff] }
 0x24d   :  { %v382_v51 = vsel %vm81_vm8, %v377_v24, %v379_v50  ;;  %579 = vmatpush.msrb.mxu0 %v443_v49 }
 0x24e   :  { %562 = vmatpush.msra.mxu3 %v382_v51 }
 0x253   :  { %v421_v52 = vpop.permute.xlu1 %420  ;;  %v529_v53 = vld [vmem:[#allocation4 + $0x88] sm:$0xff] }
 0x254   :  { %v423_v54 = vsel %vm123_vm5, %v419_v38, %v421_v52  ;;  %429 = vst.msk [vmem:[#allocation4 + $0x70] sm:$0xff] %vm46_vm0, %v421_v52  ;;  %v359_v55 = vpop.permute.xlu0 %358  ;;  %599 = vmatpush.msrb.mxu1 %v529_v53 }
 0x255   :  { %v362_v56 = vsel %vm60_vm9, %v357_v35, %v359_v55  ;;  %580 = vmatpush.msrb.mxu0 %v423_v54 }
 0x256   :  { %563 = vmatpush.msra.mxu3 %v362_v56 }
 0x257   :  { %581 = vmatpush.msrb.mxu0 %v403_v57 }
 0x258   :  { %564 = vmatpush.msra.mxu3 %v2072_v12 }
 0x259   :  { %1835 = vmatmul.msk.f32.vlgmr.msra.gmra.mxu3 %vm2588_vm14, %v1833_v58  ;;  %vm2590_vm14 = vmmov %vm2589_vm6 }
 0x25b   :  { %v361_v59 = vpop.permute.xlu1 %360  ;;  %v526_v62 = vld [vmem:[#allocation4 + $0x70] sm:$0xff] }
 0x25c   :  { %369 = vst.msk [vmem:[#allocation4 + $0x28] sm:$0xff] %vm46_vm0, %v361_v59  ;;  %v381_v63 = vpop.permute.xlu0 %380  ;;  %600 = vmatpush.msrb.mxu1 %v526_v62  ;;  %v363_v2 = vsel %vm60_vm9, %v359_v55, %v361_v59 }
 0x25d   :  { %v383_v0 = vsel %vm81_vm8, %v379_v50, %v381_v63  ;;  %389 = vst.msk [vmem:[#allocation4 + $0x40] sm:$0xff] %vm46_vm0, %v381_v63 }
 0x25e   :  { %601 = vmatpush.msrb.mxu1 %v523_v1  ;;  %582 = vmatpush.msrb.mxu0 %v383_v0 }
 0x260   :  { %583 = vmatpush.msrb.mxu0 %v363_v2 }
 0x262   :  { %584 = vmatpush.msrb.mxu0 %v2083_v15 }
 0x263   :  { %1836 = vmatmul.msk.f32.vlgmr.msrb.gmra.mxu0 %vm2589_vm6, %v1833_v58  ;;  %v517_v4 = vld [vmem:[#allocation4 + $0x28] sm:$0xff]  ;;  %vm2591_vm6 = vcmask 900096  }
 0x264   :  { %v520_v3 = vld [vmem:[#allocation4 + $0x40] sm:$0xff] }
 0x265   :  { %602 = vmatpush.msrb.mxu1 %v520_v3 }
 0x267   :  { %603 = vmatpush.msrb.mxu1 %v517_v4 }
 0x269   :  { %604 = vmatpush.msrb.mxu1 %v514_v5 }
 0x26a   :  { %1837 = vmatmul.msk.f32.vlgmr.msrb.gmra.mxu1 %vm2590_vm14, %v1833_v58  ;;  %vm2592_vm14 = vmmov %vm2591_vm6 }
 0x2dc   :  { %v566_v8 = vpop.f32.mrf.mxu3 }
 0x2dd   :  { %v567_v9 = vadd.f32 %v566_v8, %v544_v6  ;;  %v1838_v8 = vld [vmem:[%s2575_s1 + $0x10] sm:$0xff] }
 0x2df   :  { %v609_v10 = vmax.f32 %v567_v9, 0.0 }
 0x2e0   :  { %v586_v11 = vpop.f32.mrf.mxu0 }
 0x2e1   :  { %v587_v13 = vadd.f32 %v586_v11, %v544_v6  ;;  %v612_v14 = vsel %vm2050_vm11, %v609_v10, 0.0 }
 0x2e2   :  { %618 = vrot.lane.b32.xlu0 %v612_v14, %s1936_s3 }
 0x2e3   :  { %v610_v17 = vmax.f32 %v587_v13, 0.0 }
 0x2e5   :  { %v613_v18 = vsel %vm2054_vm12, %v610_v17, 0.0 }
 0x2e6   :  { %620 = vrot.lane.b32.xlu1 %v613_v18, %s1936_s3 }
 0x2e7   :  { %v606_v19 = vpop.f32.mrf.mxu1 }
 0x2e8   :  { %v607_v20 = vadd.f32 %v606_v19, %v544_v6 }
 0x2ea   :  { %v611_v21 = vmax.f32 %v607_v20, 0.0 }
 0x2ec   :  { %v614_v22 = vsel %vm2064_vm13, %v611_v21, 0.0 }
 0x2ed   :  { %622 = vrot.lane.b32.xlu2 %v614_v22, %s1936_s3 }
 0x347   :  { %v623_v24 = vpop.permute.xlu2 %622 }
 0x354   :  { %v619_v23 = vpop.permute.xlu0 %618 }
 0x355   :  { %629 = vst.msk [vmem:[#allocation3] sm:$0xff] %vm339_vm15, %v619_v23 }
 0x358   :  { %v621_v25 = vpop.permute.xlu1 %620 }
 0x359   :  { %v2177_v26 = vsel %vm333_vm7, %v619_v23, %v621_v25  ;;  %v625_v27 = vsel %vm333_vm7, %v621_v25, %v623_v24 }
 0x35a   :  { %631 = vst.msk [vmem:[#allocation3 + $0x10] sm:$0xff] %vm342_vm10, %v625_v27  ;;  %786 = vrot.lane.b32.xlu1 %v2177_v26, %s1927_s20 }
 0x35c   :  { %v2183_v28 = vld [vmem:[#allocation3] sm:$0xff] }
 0x35d   :  { %784 = vrot.lane.b32.xlu0 %v2183_v28, %s1927_s20 }
 0x361   :  { %v634_v29 = vld [vmem:[#allocation3 + $0x10] sm:$0xff] }
 0x362   :  { %637 = vst.msk [vmem:[#allocation4 + $0x10] sm:$0xff] %vm46_vm0, %v634_v29  ;;  %788 = vrot.lane.b32.xlu2 %v634_v29, %s1927_s20  ;;  %766 = vrot.lane.b32.xlu1 %v2177_v26, %s1928_s21 }
 0x365   :  { %764 = vrot.lane.b32.xlu0 %v2183_v28, %s1928_s21 }
 0x369   :  { %v802_v10 = vld [vmem:[#allocation4 + $0x10] sm:$0xff] }
 0x36a   :  { %768 = vrot.lane.b32.xlu2 %v634_v29, %s1928_s21  ;;  %746 = vrot.lane.b32.xlu1 %v2177_v26, %s1929_s0 }
 0x36d   :  { %744 = vrot.lane.b32.xlu0 %v2183_v28, %s1929_s0 }
 0x372   :  { %748 = vrot.lane.b32.xlu2 %v634_v29, %s1929_s0  ;;  %726 = vrot.lane.b32.xlu1 %v2177_v26, %s1930_s22 }
 0x375   :  { %724 = vrot.lane.b32.xlu0 %v2183_v28, %s1930_s22 }
 0x37a   :  { %728 = vrot.lane.b32.xlu2 %v634_v29, %s1930_s22  ;;  %706 = vrot.lane.b32.xlu1 %v2177_v26, %s1931_s23 }
 0x37d   :  { %704 = vrot.lane.b32.xlu0 %v2183_v28, %s1931_s23 }
 0x382   :  { %708 = vrot.lane.b32.xlu2 %v634_v29, %s1931_s23  ;;  %686 = vrot.lane.b32.xlu1 %v2177_v26, %s1932_s24 }
 0x385   :  { %684 = vrot.lane.b32.xlu0 %v2183_v28, %s1932_s24 }
 0x38a   :  { %688 = vrot.lane.b32.xlu2 %v634_v29, %s1932_s24  ;;  %666 = vrot.lane.b32.xlu1 %v2177_v26, %s1933_s25 }
 0x38d   :  { %664 = vrot.lane.b32.xlu0 %v2183_v28, %s1933_s25 }
 0x392   :  { %668 = vrot.lane.b32.xlu2 %v634_v29, %s1933_s25  ;;  %646 = vrot.lane.b32.xlu1 %v2177_v26, %s1934_s26 }
 0x395   :  { %644 = vrot.lane.b32.xlu0 %v2183_v28, %s1934_s26 }
 0x39a   :  { %648 = vrot.lane.b32.xlu2 %v634_v29, %s1934_s26  ;;  %903 = vrot.lane.b32.xlu1 %v2072_v12, %s1931_s23 }
 0x39d   :  { %831 = vperm.xlu0 %1871, %v1839_v30  }
 0x3a2   :  { %905 = vrot.lane.b32.xlu2 %v2083_v15, %s1931_s23 }
 0x3a5   :  { %907 = vrot.lane.b32.xlu0 %v2085_v16, %s1931_s23 }
 0x3bc   :  { %v789_v31 = vpop.permute.xlu2 %788 }
 0x3bd   :  { %797 = vst.msk [vmem:[#allocation4 + $0xd0] sm:$0xff] %vm46_vm0, %v789_v31 }
 0x3c4   :  { %v769_v32 = vpop.permute.xlu2 %768  ;;  %v826_v33 = vld [vmem:[#allocation4 + $0xd0] sm:$0xff] }
 0x3c5   :  { %777 = vst.msk [vmem:[#allocation4 + $0xb8] sm:$0xff] %vm46_vm0, %v769_v32  ;;  %884 = vmatpush.msra.mxu0 %v826_v33 }
 0x3cc   :  { %v749_v34 = vpop.permute.xlu2 %748  ;;  %v823_v35 = vld [vmem:[#allocation4 + $0xb8] sm:$0xff]  ;;  %v787_v36 = vpop.permute.xlu1 %786 }
 0x3cd   :  { %757 = vst.msk [vmem:[#allocation4 + $0xa0] sm:$0xff] %vm46_vm0, %v749_v34  ;;  %885 = vmatpush.msra.mxu0 %v823_v35  ;;  %v791_v12 = vsel %vm207_vm1, %v787_v36, %v789_v31 }
 0x3ce   :  { %864 = vmatpush.msrb.mxu3 %v791_v12 }
 0x3cf   :  { %v785_v15 = vpop.permute.xlu0 %784 }
 0x3d0   :  { %v790_v16 = vsel %vm207_vm1, %v785_v15, %v787_v36 }
 0x3d1   :  { %844 = vmatpush.msrb.mxu2 %v790_v16 }
 0x3d4   :  { %v729_v37 = vpop.permute.xlu2 %728  ;;  %v820_v38 = vld [vmem:[#allocation4 + $0xa0] sm:$0xff]  ;;  %v767_v39 = vpop.permute.xlu1 %766 }
 0x3d5   :  { %737 = vst.msk [vmem:[#allocation4 + $0x88] sm:$0xff] %vm46_vm0, %v729_v37  ;;  %886 = vmatpush.msra.mxu0 %v820_v38  ;;  %v771_v40 = vsel %vm186_vm2, %v767_v39, %v769_v32 }
 0x3d6   :  { %865 = vmatpush.msrb.mxu3 %v771_v40 }
 0x3d7   :  { %v765_v41 = vpop.permute.xlu0 %764 }
 0x3d8   :  { %v770_v42 = vsel %vm186_vm2, %v765_v41, %v767_v39 }
 0x3d9   :  { %845 = vmatpush.msrb.mxu2 %v770_v42 }
 0x3dc   :  { %v709_v43 = vpop.permute.xlu2 %708  ;;  %v817_v44 = vld [vmem:[#allocation4 + $0x88] sm:$0xff]  ;;  %v747_v45 = vpop.permute.xlu1 %746 }
 0x3dd   :  { %717 = vst.msk [vmem:[#allocation4 + $0x70] sm:$0xff] %vm46_vm0, %v709_v43  ;;  %887 = vmatpush.msra.mxu0 %v817_v44  ;;  %v751_v46 = vsel %vm165_vm3, %v747_v45, %v749_v34 }
 0x3de   :  { %866 = vmatpush.msrb.mxu3 %v751_v46 }
 0x3df   :  { %v745_v47 = vpop.permute.xlu0 %744 }
 0x3e0   :  { %v750_v48 = vsel %vm165_vm3, %v745_v47, %v747_v45 }
 0x3e1   :  { %846 = vmatpush.msrb.mxu2 %v750_v48 }
 0x3e4   :  { %v689_v49 = vpop.permute.xlu2 %688  ;;  %v814_v50 = vld [vmem:[#allocation4 + $0x70] sm:$0xff]  ;;  %v727_v51 = vpop.permute.xlu1 %726 }
 0x3e5   :  { %697 = vst.msk [vmem:[#allocation4 + $0x58] sm:$0xff] %vm46_vm0, %v689_v49  ;;  %888 = vmatpush.msra.mxu0 %v814_v50  ;;  %v731_v52 = vsel %vm2581_vm4, %v727_v51, %v729_v37 }
 0x3e6   :  { %867 = vmatpush.msrb.mxu3 %v731_v52 }
 0x3e7   :  { %v725_v53 = vpop.permute.xlu0 %724 }
 0x3e8   :  { %v730_v54 = vsel %vm2581_vm4, %v725_v53, %v727_v51  ;;  %vm2593_vm4 = vcmask 588800  }
 0x3e9   :  { %847 = vmatpush.msrb.mxu2 %v730_v54 }
 0x3ec   :  { %v669_v55 = vpop.permute.xlu2 %668  ;;  %v811_v56 = vld [vmem:[#allocation4 + $0x58] sm:$0xff]  ;;  %v707_v57 = vpop.permute.xlu1 %706 }
 0x3ed   :  { %677 = vst.msk [vmem:[#allocation4 + $0x40] sm:$0xff] %vm46_vm0, %v669_v55  ;;  %889 = vmatpush.msra.mxu0 %v811_v56  ;;  %v711_v58 = vsel %vm123_vm5, %v707_v57, %v709_v43 }
 0x3ee   :  { %868 = vmatpush.msrb.mxu3 %v711_v58 }
 0x3ef   :  { %v705_v59 = vpop.permute.xlu0 %704 }
 0x3f0   :  { %v710_v62 = vsel %vm123_vm5, %v705_v59, %v707_v57 }
 0x3f1   :  { %848 = vmatpush.msrb.mxu2 %v710_v62 }
 0x3f4   :  { %v649_v63 = vpop.permute.xlu2 %648  ;;  %v808_v0 = vld [vmem:[#allocation4 + $0x40] sm:$0xff]  ;;  %v687_v1 = vpop.permute.xlu1 %686 }
 0x3f5   :  { %657 = vst.msk [vmem:[#allocation4 + $0x28] sm:$0xff] %vm46_vm0, %v649_v63  ;;  %890 = vmatpush.msra.mxu0 %v808_v0  ;;  %v691_v2 = vsel %vm2591_vm6, %v687_v1, %v689_v49  ;;  %vm2594_vm6 = vmmov %vm2593_vm4 }
 0x3f6   :  { %869 = vmatpush.msrb.mxu3 %v691_v2  ;;  %v1844_v2 = vld [vmem:[%s2576_s2 + $0x18] sm:$0xff] }
 0x3f7   :  { %v685_v3 = vpop.permute.xlu0 %684 }
 0x3f8   :  { %v690_v4 = vsel %vm2592_vm14, %v685_v3, %v687_v1  ;;  %vm2595_vm14 = vmmov %vm2593_vm4 }
 0x3f9   :  { %849 = vmatpush.msrb.mxu2 %v690_v4 }
 0x3fc   :  { %v805_v5 = vld [vmem:[#allocation4 + $0x28] sm:$0xff]  ;;  %v667_v6 = vpop.permute.xlu1 %666  ;;  %v906_v29 = vpop.permute.xlu2 %905 }
 0x3fd   :  { %891 = vmatpush.msra.mxu0 %v805_v5  ;;  %v671_v9 = vsel %vm81_vm8, %v667_v6, %v669_v55 }
 0x3fe   :  { %870 = vmatpush.msrb.mxu3 %v671_v9 }
 0x3ff   :  { %892 = vmatpush.msra.mxu0 %v802_v10  ;;  %v665_v11 = vpop.permute.xlu0 %664 }
 0x400   :  { %1842 = vmatmul.msk.f32.vlgmr.msra.gmra.mxu0 %vm2593_vm4, %v1838_v8  ;;  %v670_v13 = vsel %vm81_vm8, %v665_v11, %v667_v6  ;;  %vm2596_vm4 = vcmask 883712  }
 0x401   :  { %850 = vmatpush.msrb.mxu2 %v670_v13 }
 0x404   :  { %v647_v14 = vpop.permute.xlu1 %646 }
 0x405   :  { %v651_v17 = vsel %vm60_vm9, %v647_v14, %v649_v63 }
 0x406   :  { %871 = vmatpush.msrb.mxu3 %v651_v17 }
 0x407   :  { %v645_v18 = vpop.permute.xlu0 %644 }
 0x408   :  { %v650_v19 = vsel %vm60_vm9, %v645_v18, %v647_v14  ;;  %872 = vmatpush.msrb.mxu3 %v2177_v26 }
 0x409   :  { %851 = vmatpush.msrb.mxu2 %v650_v19  ;;  %1841 = vmatmul.msk.f32.vlgmr.msrb.gmra.mxu3 %vm2594_vm6, %v1838_v8  ;;  %vm2597_vm6 = vcmask 900096  }
 0x40b   :  { %852 = vmatpush.msrb.mxu2 %v2183_v28 }
 0x40c   :  { %1840 = vmatmul.msk.f32.vlgmr.msrb.gmra.mxu2 %vm2595_vm14, %v1838_v8  ;;  %v904_v30 = vpop.permute.xlu1 %903  ;;  %vm2598_vm14 = vmmov %vm2596_vm4 }
 0x40d   :  { %v909_v34 = vsel %vm123_vm5, %v904_v30, %v906_v29 }
 0x40f   :  { %v832_v20 = vpop.permute.xlu0 %831 }
 0x417   :  { %v908_v23 = vpop.permute.xlu0 %907 }
 0x418   :  { %v910_v31 = vsel %vm123_vm5, %v906_v29, %v908_v23 }
 0x47d   :  { %v894_v21 = vpop.f32.mrf.mxu0 }
 0x47e   :  { %v895_v22 = vadd.f32 %v894_v21, %v832_v20 }
 0x480   :  { %v916_v24 = vadd.f32 %v908_v23, %v895_v22  ;;  %v1843_v22 = vld [vmem:[%s2575_s1 + $0x18] sm:$0xff] }
 0x482   :  { %v919_v25 = vsel %vm2064_vm13, %v916_v24, 0.0 }
 0x483   :  { %927 = vrot.lane.b32.xlu0 %v919_v25, %s1936_s3 }
 0x48c   :  { %v874_v27 = vpop.f32.mrf.mxu3 }
 0x48d   :  { %v875_v26 = vadd.f32 %v874_v27, %v832_v20 }
 0x48f   :  { %v854_v32 = vpop.f32.mrf.mxu2  ;;  %v915_v28 = vadd.f32 %v910_v31, %v875_v26 }
 0x490   :  { %v855_v33 = vadd.f32 %v854_v32, %v832_v20 }
 0x491   :  { %v918_v35 = vsel %vm2054_vm12, %v915_v28, 0.0 }
 0x492   :  { %v914_v36 = vadd.f32 %v909_v34, %v855_v33  ;;  %925 = vrot.lane.b32.xlu2 %v918_v35, %s1936_s3 }
 0x494   :  { %v917_v12 = vsel %vm2050_vm11, %v914_v36, 0.0 }
 0x495   :  { %923 = vrot.lane.b32.xlu1 %v917_v12, %s1936_s3 }
 0x4ec   :  { %v926_v16 = vpop.permute.xlu2 %925 }
 0x4f5   :  { %v928_v15 = vpop.permute.xlu0 %927 }
 0x4f6   :  { %v930_v37 = vsel %vm333_vm7, %v926_v16, %v928_v15 }
 0x4f7   :  { %936 = vst.msk [vmem:[#allocation2 + $0x10] sm:$0xff] %vm342_vm10, %v930_v37 }
 0x4fe   :  { %v2278_v38 = vld [vmem:[#allocation2 + $0x10] sm:$0xff] }
 0x4ff   :  { %1093 = vrot.lane.b32.xlu2 %v2278_v38, %s1927_s20  ;;  %942 = vst.msk [vmem:[#allocation4 + $0x10] sm:$0xff] %vm46_vm0, %v2278_v38 }
 0x506   :  { %v1107_v32 = vld [vmem:[#allocation4 + $0x10] sm:$0xff] }
 0x507   :  { %v924_v39 = vpop.permute.xlu1 %923 }
 0x508   :  { %v2285_v40 = vsel %vm333_vm7, %v924_v39, %v926_v16  ;;  %934 = vst.msk [vmem:[#allocation2] sm:$0xff] %vm339_vm15, %v924_v39 }
 0x509   :  { %1091 = vrot.lane.b32.xlu1 %v2285_v40, %s1927_s20  ;;  %1051 = vrot.lane.b32.xlu2 %v2285_v40, %s1929_s0 }
 0x50f   :  { %v2292_v41 = vld [vmem:[#allocation2] sm:$0xff] }
 0x510   :  { %1089 = vrot.lane.b32.xlu0 %v2292_v41, %s1927_s20 }
 0x511   :  { %1073 = vrot.lane.b32.xlu1 %v2278_v38, %s1928_s21  ;;  %1033 = vrot.lane.b32.xlu2 %v2278_v38, %s1930_s22 }
 0x518   :  { %1069 = vrot.lane.b32.xlu0 %v2292_v41, %s1928_s21 }
 0x519   :  { %1013 = vrot.lane.b32.xlu2 %v2278_v38, %s1931_s23  ;;  %1031 = vrot.lane.b32.xlu1 %v2285_v40, %s1930_s22 }
 0x520   :  { %1049 = vrot.lane.b32.xlu0 %v2292_v41, %s1929_s0 }
 0x521   :  { %993 = vrot.lane.b32.xlu2 %v2278_v38, %s1932_s24  ;;  %1011 = vrot.lane.b32.xlu1 %v2285_v40, %s1931_s23 }
 0x528   :  { %1071 = vrot.lane.b32.xlu0 %v2285_v40, %s1928_s21 }
 0x529   :  { %973 = vrot.lane.b32.xlu2 %v2278_v38, %s1933_s25  ;;  %991 = vrot.lane.b32.xlu1 %v2285_v40, %s1932_s24 }
 0x530   :  { %1053 = vrot.lane.b32.xlu0 %v2278_v38, %s1929_s0 }
 0x531   :  { %953 = vrot.lane.b32.xlu2 %v2278_v38, %s1934_s26  ;;  %971 = vrot.lane.b32.xlu1 %v2285_v40, %s1933_s25 }
 0x538   :  { %1029 = vrot.lane.b32.xlu0 %v2292_v41, %s1930_s22 }
 0x539   :  { %969 = vrot.lane.b32.xlu2 %v2292_v41, %s1933_s25  ;;  %951 = vrot.lane.b32.xlu1 %v2285_v40, %s1934_s26 }
 0x540   :  { %1009 = vrot.lane.b32.xlu0 %v2292_v41, %s1931_s23 }
 0x541   :  { %989 = vrot.lane.b32.xlu1 %v2292_v41, %s1932_s24 }
 0x548   :  { %949 = vrot.lane.b32.xlu0 %v2292_v41, %s1934_s26 }
 0x549   :  { %1136 = vperm.xlu1 %1873, %v1844_v2  }
 0x559   :  { %v1094_v42 = vpop.permute.xlu2 %1093 }
 0x55a   :  { %1102 = vst.msk [vmem:[#allocation4 + $0xd0] sm:$0xff] %vm46_vm0, %v1094_v42 }
 0x561   :  { %v1131_v43 = vld [vmem:[#allocation4 + $0xd0] sm:$0xff] }
 0x562   :  { %1189 = vmatpush.msra.mxu3 %v1131_v43 }
 0x563   :  { %v1052_v44 = vpop.permute.xlu2 %1051 }
 0x56b   :  { %v1034_v45 = vpop.permute.xlu2 %1033 }
 0x56c   :  { %1042 = vst.msk [vmem:[#allocation4 + $0x88] sm:$0xff] %vm46_vm0, %v1034_v45 }
 0x573   :  { %v1014_v46 = vpop.permute.xlu2 %1013  ;;  %v1122_v19 = vld [vmem:[#allocation4 + $0x88] sm:$0xff] }
 0x574   :  { %1022 = vst.msk [vmem:[#allocation4 + $0x70] sm:$0xff] %vm46_vm0, %v1014_v46 }
 0x57b   :  { %v1092_v47 = vpop.permute.xlu1 %1091  ;;  %v994_v48 = vpop.permute.xlu2 %993  ;;  %v1119_v21 = vld [vmem:[#allocation4 + $0x70] sm:$0xff] }
 0x57c   :  { %v1096_v49 = vsel %vm207_vm1, %v1092_v47, %v1094_v42  ;;  %1002 = vst.msk [vmem:[#allocation4 + $0x58] sm:$0xff] %vm46_vm0, %v994_v48 }
 0x57d   :  { %1169 = vmatpush.msra.mxu2 %v1096_v49 }
 0x582   :  { %v1090_v50 = vpop.permute.xlu0 %1089 }
 0x583   :  { %v1095_v51 = vsel %vm207_vm1, %v1090_v50, %v1092_v47  ;;  %v1074_v52 = vpop.permute.xlu1 %1073  ;;  %v974_v53 = vpop.permute.xlu2 %973  ;;  %v1116_v23 = vld [vmem:[#allocation4 + $0x58] sm:$0xff] }
 0x584   :  { %1082 = vst.msk [vmem:[#allocation4 + $0xb8] sm:$0xff] %vm46_vm0, %v1074_v52  ;;  %1149 = vmatpush.msra.mxu1 %v1095_v51 }
 0x585   :  { %982 = vst.msk [vmem:[#allocation4 + $0x40] sm:$0xff] %vm46_vm0, %v974_v53 }
 0x58a   :  { %v1070_v54 = vpop.permute.xlu0 %1069 }
 0x58b   :  { %v954_v55 = vpop.permute.xlu2 %953  ;;  %v1032_v56 = vpop.permute.xlu1 %1031  ;;  %v1128_v57 = vld [vmem:[#allocation4 + $0xb8] sm:$0xff] }
 0x58c   :  { %962 = vst.msk [vmem:[#allocation4 + $0x28] sm:$0xff] %vm46_vm0, %v954_v55  ;;  %1190 = vmatpush.msra.mxu3 %v1128_v57  ;;  %v1036_v8 = vsel %vm2596_vm4, %v1032_v56, %v1034_v45  ;;  %vm2599_vm4 = vcmask 588800   ;;  %v1113_v25 = vld [vmem:[#allocation4 + $0x40] sm:$0xff] }
 0x592   :  { %v1050_v58 = vpop.permute.xlu0 %1049 }
 0x593   :  { %v1012_v59 = vpop.permute.xlu1 %1011  ;;  %v1055_v3 = vsel %vm165_vm3, %v1050_v58, %v1052_v44  ;;  %v1110_v26 = vld [vmem:[#allocation4 + $0x28] sm:$0xff]  ;;  %v970_v31 = vpop.permute.xlu2 %969 }
 0x594   :  { %v1016_v9 = vsel %vm123_vm5, %v1012_v59, %v1014_v46 }
 0x59a   :  { %v1072_v62 = vpop.permute.xlu0 %1071 }
 0x59b   :  { %v1075_v63 = vsel %vm186_vm2, %v1070_v54, %v1072_v62  ;;  %v1076_v0 = vsel %vm186_vm2, %v1072_v62, %v1074_v52  ;;  %v992_v1 = vpop.permute.xlu1 %991 }
 0x59c   :  { %1150 = vmatpush.msra.mxu1 %v1075_v63  ;;  %1170 = vmatpush.msra.mxu2 %v1076_v0  ;;  %v996_v10 = vsel %vm2597_vm6, %v992_v1, %v994_v48 }
 0x59e   :  { %1151 = vmatpush.msra.mxu1 %v1055_v3 }
 0x5a2   :  { %v1054_v4 = vpop.permute.xlu0 %1053 }
 0x5a3   :  { %v1056_v5 = vsel %vm165_vm3, %v1052_v44, %v1054_v4  ;;  %1062 = vst.msk [vmem:[#allocation4 + $0xa0] sm:$0xff] %vm46_vm0, %v1054_v4  ;;  %v972_v6 = vpop.permute.xlu1 %971 }
 0x5a4   :  { %1171 = vmatpush.msra.mxu2 %v1056_v5  ;;  %v976_v17 = vsel %vm81_vm8, %v972_v6, %v974_v53  ;;  %v975_v28 = vsel %vm81_vm8, %v970_v31, %v972_v6 }
 0x5a6   :  { %1172 = vmatpush.msra.mxu2 %v1036_v8 }
 0x5a8   :  { %1173 = vmatpush.msra.mxu2 %v1016_v9 }
 0x5aa   :  { %v1030_v11 = vpop.permute.xlu0 %1029  ;;  %v1125_v13 = vld [vmem:[#allocation4 + $0xa0] sm:$0xff]  ;;  %1174 = vmatpush.msra.mxu2 %v996_v10 }
 0x5ab   :  { %v1035_v14 = vsel %vm2598_vm14, %v1030_v11, %v1032_v56  ;;  %1191 = vmatpush.msra.mxu3 %v1125_v13  ;;  %v952_v18 = vpop.permute.xlu1 %951  ;;  %vm2600_vm14 = vmmov %vm2599_vm4 }
 0x5ac   :  { %v956_v20 = vsel %vm60_vm9, %v952_v18, %v954_v55  ;;  %1152 = vmatpush.msra.mxu1 %v1035_v14  ;;  %1175 = vmatpush.msra.mxu2 %v976_v17  ;;  %v1849_v55 = vld [vmem:[%s2576_s2 + $0x20] sm:$0xff] }
 0x5ad   :  { %1192 = vmatpush.msra.mxu3 %v1122_v19 }
 0x5ae   :  { %1176 = vmatpush.msra.mxu2 %v956_v20 }
 0x5af   :  { %1193 = vmatpush.msra.mxu3 %v1119_v21 }
 0x5b0   :  { %1177 = vmatpush.msra.mxu2 %v2285_v40 }
 0x5b1   :  { %1194 = vmatpush.msra.mxu3 %v1116_v23  ;;  %1846 = vmatmul.msk.f32.vlgmr.msra.gmra.mxu2 %vm2599_vm4, %v1843_v22 }
 0x5b2   :  { %v1010_v24 = vpop.permute.xlu0 %1009 }
 0x5b3   :  { %v1015_v27 = vsel %vm123_vm5, %v1010_v24, %v1012_v59  ;;  %1195 = vmatpush.msra.mxu3 %v1113_v25  ;;  %v990_v29 = vpop.permute.xlu1 %989 }
 0x5b4   :  { %v995_v30 = vsel %vm2597_vm6, %v990_v29, %v992_v1  ;;  %1153 = vmatpush.msra.mxu1 %v1015_v27  ;;  %vm2601_vm6 = vcmask 883712  }
 0x5b5   :  { %1196 = vmatpush.msra.mxu3 %v1110_v26 }
 0x5b6   :  { %1154 = vmatpush.msra.mxu1 %v995_v30 }
 0x5b7   :  { %1197 = vmatpush.msra.mxu3 %v1107_v32 }
 0x5b8   :  { %1847 = vmatmul.msk.f32.vlgmr.msra.gmra.mxu3 %vm2600_vm14, %v1843_v22  ;;  %1155 = vmatpush.msra.mxu1 %v975_v28  ;;  %vm2602_vm14 = vmmov %vm2601_vm6 }
 0x5ba   :  { %v950_v33 = vpop.permute.xlu0 %949 }
 0x5bb   :  { %v955_v34 = vsel %vm60_vm9, %v950_v33, %v952_v18  ;;  %v1137_v35 = vpop.permute.xlu1 %1136  ;;  %v1848_v33 = vld [vmem:[%s2575_s1 + $0x20] sm:$0xff] }
 0x5bc   :  { %1156 = vmatpush.msra.mxu1 %v955_v34 }
 0x5be   :  { %1157 = vmatpush.msra.mxu1 %v2292_v41 }
 0x5bf   :  { %1845 = vmatmul.msk.f32.vlgmr.msra.gmra.mxu1 %vm2599_vm4, %v1843_v22  ;;  %vm2603_vm4 = vcmask 900096  }
 0x634   :  { %v1179_v36 = vpop.f32.mrf.mxu2 }
 0x635   :  { %v1180_v12 = vadd.f32 %v1179_v36, %v1137_v35 }
 0x637   :  { %v1203_v15 = vmax.f32 %v1180_v12, 0.0 }
 0x639   :  { %v1206_v16 = vsel %vm2054_vm12, %v1203_v15, 0.0 }
 0x63a   :  { %1213 = vrot.lane.b32.xlu2 %v1206_v16, %s1936_s3 }
 0x63b   :  { %v1199_v37 = vpop.f32.mrf.mxu3 }
 0x63c   :  { %v1200_v39 = vadd.f32 %v1199_v37, %v1137_v35  ;;  %v1159_v42 = vpop.f32.mrf.mxu1 }
 0x63d   :  { %v1160_v43 = vadd.f32 %v1159_v42, %v1137_v35 }
 0x63e   :  { %v1204_v44 = vmax.f32 %v1200_v39, 0.0 }
 0x63f   :  { %v1202_v45 = vmax.f32 %v1160_v43, 0.0 }
 0x640   :  { %v1207_v46 = vsel %vm2064_vm13, %v1204_v44, 0.0 }
 0x641   :  { %1215 = vrot.lane.b32.xlu0 %v1207_v46, %s1936_s3  ;;  %v1205_v47 = vsel %vm2050_vm11, %v1202_v45, 0.0 }
 0x642   :  { %1211 = vrot.lane.b32.xlu1 %v1205_v47, %s1936_s3 }
 0x694   :  { %v1214_v48 = vpop.permute.xlu2 %1213 }
 0x6b3   :  { %v1216_v49 = vpop.permute.xlu0 %1215 }
 0x6b4   :  { %v1218_v50 = vsel %vm333_vm7, %v1214_v48, %v1216_v49  ;;  %v1212_v51 = vpop.permute.xlu1 %1211 }
 0x6b5   :  { %1224 = vst.msk [vmem:[#allocation3 + $0x10] sm:$0xff] %vm342_vm10, %v1218_v50  ;;  %v2383_v52 = vsel %vm333_vm7, %v1212_v51, %v1214_v48 }
 0x6b6   :  { %1222 = vst.msk [vmem:[#allocation3] sm:$0xff] %vm339_vm15, %v1212_v51  ;;  %1379 = vrot.lane.b32.xlu1 %v2383_v52, %s1927_s20 }
 0x6bc   :  { %v1373_v53 = vld [vmem:[#allocation3 + $0x10] sm:$0xff] }
 0x6bd   :  { %1381 = vrot.lane.b32.xlu2 %v1373_v53, %s1927_s20  ;;  %v2389_v54 = vld [vmem:[#allocation3] sm:$0xff]  ;;  %1230 = vst.msk [vmem:[#allocation4 + $0x10] sm:$0xff] %vm46_vm0, %v1373_v53 }
 0x6be   :  { %1377 = vrot.lane.b32.xlu0 %v2389_v54, %s1927_s20  ;;  %1359 = vrot.lane.b32.xlu1 %v2383_v52, %s1928_s21 }
 0x6c4   :  { %v1395_v36 = vld [vmem:[#allocation4 + $0x10] sm:$0xff] }
 0x6c5   :  { %1361 = vrot.lane.b32.xlu2 %v1373_v53, %s1928_s21 }
 0x6c6   :  { %1357 = vrot.lane.b32.xlu0 %v2389_v54, %s1928_s21  ;;  %1339 = vrot.lane.b32.xlu1 %v2383_v52, %s1929_s0 }
 0x6cd   :  { %1341 = vrot.lane.b32.xlu2 %v1373_v53, %s1929_s0 }
 0x6ce   :  { %1337 = vrot.lane.b32.xlu0 %v2389_v54, %s1929_s0  ;;  %1319 = vrot.lane.b32.xlu1 %v2383_v52, %s1930_s22 }
 0x6d5   :  { %1321 = vrot.lane.b32.xlu2 %v1373_v53, %s1930_s22 }
 0x6d6   :  { %1317 = vrot.lane.b32.xlu0 %v2389_v54, %s1930_s22  ;;  %1299 = vrot.lane.b32.xlu1 %v2383_v52, %s1931_s23 }
 0x6dd   :  { %1301 = vrot.lane.b32.xlu2 %v1373_v53, %s1931_s23 }
 0x6de   :  { %1297 = vrot.lane.b32.xlu0 %v2389_v54, %s1931_s23  ;;  %1279 = vrot.lane.b32.xlu1 %v2383_v52, %s1932_s24 }
 0x6e5   :  { %1281 = vrot.lane.b32.xlu2 %v1373_v53, %s1932_s24 }
 0x6e6   :  { %1277 = vrot.lane.b32.xlu0 %v2389_v54, %s1932_s24  ;;  %1259 = vrot.lane.b32.xlu1 %v2383_v52, %s1933_s25 }
 0x6ed   :  { %1261 = vrot.lane.b32.xlu2 %v1373_v53, %s1933_s25 }
 0x6ee   :  { %1257 = vrot.lane.b32.xlu0 %v2389_v54, %s1933_s25  ;;  %1239 = vrot.lane.b32.xlu1 %v2383_v52, %s1934_s26 }
 0x6f5   :  { %1241 = vrot.lane.b32.xlu2 %v1373_v53, %s1934_s26 }
 0x6f6   :  { %1237 = vrot.lane.b32.xlu0 %v2389_v54, %s1934_s26  ;;  %1498 = vrot.lane.b32.xlu1 %v2285_v40, %s1931_s23 }
 0x6fd   :  { %1424 = vperm.xlu2 %1872, %v1849_v55  }
 0x6fe   :  { %1496 = vrot.lane.b32.xlu0 %v2292_v41, %s1931_s23 }
 0x705   :  { %1500 = vrot.lane.b32.xlu2 %v2278_v38, %s1931_s23 }
 0x717   :  { %v1382_v56 = vpop.permute.xlu2 %1381 }
 0x718   :  { %1390 = vst.msk [vmem:[#allocation4 + $0xd0] sm:$0xff] %vm46_vm0, %v1382_v56 }
 0x71f   :  { %v1362_v57 = vpop.permute.xlu2 %1361  ;;  %v1419_v58 = vld [vmem:[#allocation4 + $0xd0] sm:$0xff] }
 0x720   :  { %1370 = vst.msk [vmem:[#allocation4 + $0xb8] sm:$0xff] %vm46_vm0, %v1362_v57  ;;  %1477 = vmatpush.msrb.mxu2 %v1419_v58 }
 0x727   :  { %v1342_v40 = vpop.permute.xlu2 %1341  ;;  %v1416_v59 = vld [vmem:[#allocation4 + $0xb8] sm:$0xff] }
 0x728   :  { %1350 = vst.msk [vmem:[#allocation4 + $0xa0] sm:$0xff] %vm46_vm0, %v1342_v40  ;;  %1478 = vmatpush.msrb.mxu2 %v1416_v59  ;;  %v1380_v62 = vpop.permute.xlu1 %1379 }
 0x729   :  { %v1384_v63 = vsel %vm207_vm1, %v1380_v62, %v1382_v56 }
 0x72a   :  { %1457 = vmatpush.msrb.mxu1 %v1384_v63 }
 0x72f   :  { %v1322_v41 = vpop.permute.xlu2 %1321  ;;  %v1413_v0 = vld [vmem:[#allocation4 + $0xa0] sm:$0xff] }
 0x730   :  { %1330 = vst.msk [vmem:[#allocation4 + $0x88] sm:$0xff] %vm46_vm0, %v1322_v41  ;;  %1479 = vmatpush.msrb.mxu2 %v1413_v0  ;;  %v1378_v38 = vpop.permute.xlu0 %1377  ;;  %v1360_v1 = vpop.permute.xlu1 %1359 }
 0x731   :  { %v1383_v2 = vsel %vm207_vm1, %v1378_v38, %v1380_v62  ;;  %v1364_v3 = vsel %vm186_vm2, %v1360_v1, %v1362_v57 }
 0x732   :  { %1437 = vmatpush.msrb.mxu0 %v1383_v2  ;;  %1458 = vmatpush.msrb.mxu1 %v1364_v3 }
 0x737   :  { %v1302_v4 = vpop.permute.xlu2 %1301  ;;  %v1410_v5 = vld [vmem:[#allocation4 + $0x88] sm:$0xff] }
 0x738   :  { %1310 = vst.msk [vmem:[#allocation4 + $0x70] sm:$0xff] %vm46_vm0, %v1302_v4  ;;  %1480 = vmatpush.msrb.mxu2 %v1410_v5  ;;  %v1358_v6 = vpop.permute.xlu0 %1357  ;;  %v1340_v8 = vpop.permute.xlu1 %1339  ;;  %v1854_v5 = vld [vmem:[%s2576_s2 + $0x28] sm:$0xff] }
 0x739   :  { %v1363_v9 = vsel %vm186_vm2, %v1358_v6, %v1360_v1  ;;  %v1344_v10 = vsel %vm165_vm3, %v1340_v8, %v1342_v40 }
 0x73a   :  { %1438 = vmatpush.msrb.mxu0 %v1363_v9  ;;  %1459 = vmatpush.msrb.mxu1 %v1344_v10 }
 0x73f   :  { %v1282_v11 = vpop.permute.xlu2 %1281  ;;  %v1407_v13 = vld [vmem:[#allocation4 + $0x70] sm:$0xff] }
 0x740   :  { %1290 = vst.msk [vmem:[#allocation4 + $0x58] sm:$0xff] %vm46_vm0, %v1282_v11  ;;  %1481 = vmatpush.msrb.mxu2 %v1407_v13  ;;  %v1338_v14 = vpop.permute.xlu0 %1337  ;;  %v1320_v17 = vpop.permute.xlu1 %1319 }
 0x741   :  { %v1343_v18 = vsel %vm165_vm3, %v1338_v14, %v1340_v8  ;;  %v1324_v19 = vsel %vm2601_vm6, %v1320_v17, %v1322_v41  ;;  %vm2604_vm6 = vmmov %vm2603_vm4 }
 0x742   :  { %1439 = vmatpush.msrb.mxu0 %v1343_v18  ;;  %1460 = vmatpush.msrb.mxu1 %v1324_v19 }
 0x747   :  { %v1262_v20 = vpop.permute.xlu2 %1261  ;;  %v1404_v21 = vld [vmem:[#allocation4 + $0x58] sm:$0xff] }
 0x748   :  { %1270 = vst.msk [vmem:[#allocation4 + $0x40] sm:$0xff] %vm46_vm0, %v1262_v20  ;;  %1482 = vmatpush.msrb.mxu2 %v1404_v21  ;;  %v1318_v22 = vpop.permute.xlu0 %1317  ;;  %v1300_v23 = vpop.permute.xlu1 %1299 }
 0x749   :  { %v1323_v24 = vsel %vm2602_vm14, %v1318_v22, %v1320_v17  ;;  %v1304_v25 = vsel %vm123_vm5, %v1300_v23, %v1302_v4  ;;  %vm2605_vm14 = vcmask 588800  }
 0x74a   :  { %1440 = vmatpush.msrb.mxu0 %v1323_v24  ;;  %1461 = vmatpush.msrb.mxu1 %v1304_v25 }
 0x74f   :  { %v1242_v27 = vpop.permute.xlu2 %1241  ;;  %v1401_v29 = vld [vmem:[#allocation4 + $0x40] sm:$0xff] }
 0x750   :  { %1250 = vst.msk [vmem:[#allocation4 + $0x28] sm:$0xff] %vm46_vm0, %v1242_v27  ;;  %1483 = vmatpush.msrb.mxu2 %v1401_v29  ;;  %v1298_v26 = vpop.permute.xlu0 %1297  ;;  %v1280_v30 = vpop.permute.xlu1 %1279 }
 0x751   :  { %v1303_v31 = vsel %vm123_vm5, %v1298_v26, %v1300_v23  ;;  %v1284_v32 = vsel %vm2603_vm4, %v1280_v30, %v1282_v11  ;;  %vm2606_vm4 = vmmov %vm2605_vm14 }
 0x752   :  { %1441 = vmatpush.msrb.mxu0 %v1303_v31  ;;  %1462 = vmatpush.msrb.mxu1 %v1284_v32 }
 0x757   :  { %v1398_v28 = vld [vmem:[#allocation4 + $0x28] sm:$0xff]  ;;  %v1425_v45 = vpop.permute.xlu2 %1424 }
 0x758   :  { %1484 = vmatpush.msrb.mxu2 %v1398_v28  ;;  %v1278_v34 = vpop.permute.xlu0 %1277  ;;  %v1260_v35 = vpop.permute.xlu1 %1259 }
 0x759   :  { %v1283_v12 = vsel %vm2604_vm6, %v1278_v34, %v1280_v30  ;;  %v1264_v15 = vsel %vm81_vm8, %v1260_v35, %v1262_v20  ;;  %vm2607_vm6 = vmmov %vm2606_vm4 }
 0x75a   :  { %1485 = vmatpush.msrb.mxu2 %v1395_v36  ;;  %1442 = vmatpush.msrb.mxu0 %v1283_v12 }
 0x75b   :  { %1852 = vmatmul.msk.f32.vlgmr.msrb.gmra.mxu2 %vm2605_vm14, %v1848_v33  ;;  %1463 = vmatpush.msrb.mxu1 %v1264_v15 }
 0x75f   :  { %v1501_v48 = vpop.permute.xlu2 %1500 }
 0x760   :  { %v1258_v16 = vpop.permute.xlu0 %1257  ;;  %v1240_v37 = vpop.permute.xlu1 %1239 }
 0x761   :  { %v1263_v39 = vsel %vm81_vm8, %v1258_v16, %v1260_v35  ;;  %v1244_v42 = vsel %vm60_vm9, %v1240_v37, %v1242_v27 }
 0x762   :  { %1443 = vmatpush.msrb.mxu0 %v1263_v39  ;;  %1464 = vmatpush.msrb.mxu1 %v1244_v42 }
 0x764   :  { %1465 = vmatpush.msrb.mxu1 %v2383_v52 }
 0x765   :  { %1851 = vmatmul.msk.f32.vlgmr.msrb.gmra.mxu1 %vm2606_vm4, %v1848_v33 }
 0x768   :  { %v1238_v43 = vpop.permute.xlu0 %1237  ;;  %v1499_v49 = vpop.permute.xlu1 %1498 }
 0x769   :  { %v1243_v44 = vsel %vm60_vm9, %v1238_v43, %v1240_v37  ;;  %v1503_v55 = vsel %vm123_vm5, %v1499_v49, %v1501_v48 }
 0x76a   :  { %1444 = vmatpush.msrb.mxu0 %v1243_v44 }
 0x76c   :  { %1445 = vmatpush.msrb.mxu0 %v2389_v54 }
 0x76d   :  { %1850 = vmatmul.msk.f32.vlgmr.msrb.gmra.mxu0 %vm2607_vm6, %v1848_v33 }
 0x770   :  { %v1497_v57 = vpop.permute.xlu0 %1496 }
 0x771   :  { %v1502_v59 = vsel %vm123_vm5, %v1497_v57, %v1499_v49 }
 0x7de   :  { %v1487_v46 = vpop.f32.mrf.mxu2 }
 0x7df   :  { %v1488_v47 = vadd.f32 %v1487_v46, %v1425_v45 }
 0x7e1   :  { %v1509_v50 = vadd.f32 %v1501_v48, %v1488_v47 }
 0x7e2   :  { %v1467_v51 = vpop.f32.mrf.mxu1 }
 0x7e3   :  { %v1512_v52 = vsel %vm2064_vm13, %v1509_v50, 0.0  ;;  %v1468_v53 = vadd.f32 %v1467_v51, %v1425_v45 }
 0x7e4   :  { %1520 = vrot.lane.b32.xlu2 %v1512_v52, %s1936_s3 }
 0x7e5   :  { %v1508_v56 = vadd.f32 %v1503_v55, %v1468_v53  ;;  %v1853_v55 = vld [vmem:[%s2575_s1 + $0x28] sm:$0xff]  ;;  %s1938_s1 = smov [#allocation8]  }
 0x7e7   :  { %v1511_v54 = vsel %vm2054_vm12, %v1508_v56, 0.0 }
 0x7e8   :  { %1518 = vrot.lane.b32.xlu1 %v1511_v54, %s1936_s3 }
 0x7ea   :  { %v1447_v58 = vpop.f32.mrf.mxu0 }
 0x7eb   :  { %v1448_v40 = vadd.f32 %v1447_v58, %v1425_v45 }
 0x7ed   :  { %v1507_v62 = vadd.f32 %v1502_v59, %v1448_v40 }
 0x7ef   :  { %v1510_v63 = vsel %vm2050_vm11, %v1507_v62, 0.0 }
 0x7f0   :  { %1516 = vrot.lane.b32.xlu0 %v1510_v63, %s1936_s3 }
 0x83e   :  { %v1521_v41 = vpop.permute.xlu2 %1520 }
 0x85a   :  { %v1519_v0 = vpop.permute.xlu1 %1518 }
 0x85b   :  { %v1523_v38 = vsel %vm333_vm7, %v1519_v0, %v1521_v41 }
 0x85c   :  { %1529 = vst.msk [vmem:[#allocation2 + $0x10] sm:$0xff] %vm342_vm10, %v1523_v38 }
 0x862   :  { %v1517_v1 = vpop.permute.xlu0 %1516 }
 0x863   :  { %1527 = vst.msk [vmem:[#allocation2] sm:$0xff] %vm339_vm15, %v1517_v1  ;;  %v2485_v2 = vsel %vm333_vm7, %v1517_v1, %v1519_v0  ;;  %v1678_v3 = vld [vmem:[#allocation2 + $0x10] sm:$0xff]  ;;  %vm2608_vm7 = vcmask 883712   ;;  %vm2609_vm15 = vcmask 900096  }
 0x864   :  { %1535 = vst.msk [vmem:[#allocation4 + $0x10] sm:$0xff] %vm46_vm0, %v1678_v3 }
 0x86a   :  { %v2488_v4 = vld [vmem:[#allocation2] sm:$0xff] }
 0x86b   :  { %1682 = vrot.lane.b32.xlu0 %v2488_v4, %s1927_s20  ;;  %1662 = vrot.lane.b32.xlu2 %v2488_v4, %s1928_s21  ;;  %v1700_v40 = vld [vmem:[#allocation4 + $0x10] sm:$0xff] }
 0x86c   :  { %1642 = vrot.lane.b32.xlu1 %v2488_v4, %s1929_s0 }
 0x873   :  { %1664 = vrot.lane.b32.xlu0 %v2485_v2, %s1928_s21  ;;  %1644 = vrot.lane.b32.xlu2 %v2485_v2, %s1929_s0 }
 0x874   :  { %1622 = vrot.lane.b32.xlu1 %v2488_v4, %s1930_s22 }
 0x87b   :  { %1686 = vrot.lane.b32.xlu0 %v1678_v3, %s1927_s20  ;;  %1624 = vrot.lane.b32.xlu2 %v2485_v2, %s1930_s22 }
 0x87c   :  { %1602 = vrot.lane.b32.xlu1 %v2488_v4, %s1931_s23 }
 0x883   :  { %1666 = vrot.lane.b32.xlu0 %v1678_v3, %s1928_s21  ;;  %1604 = vrot.lane.b32.xlu2 %v2485_v2, %s1931_s23 }
 0x884   :  { %1582 = vrot.lane.b32.xlu1 %v2488_v4, %s1932_s24 }
 0x88b   :  { %1646 = vrot.lane.b32.xlu0 %v1678_v3, %s1929_s0  ;;  %1584 = vrot.lane.b32.xlu2 %v2485_v2, %s1932_s24 }
 0x88c   :  { %1562 = vrot.lane.b32.xlu1 %v2488_v4, %s1933_s25 }
 0x893   :  { %1626 = vrot.lane.b32.xlu0 %v1678_v3, %s1930_s22  ;;  %1564 = vrot.lane.b32.xlu2 %v2485_v2, %s1933_s25  ;;  %s1818_s22 = sshll.u32 %s1938_s1, 4  ;;  %s1819_s22 = int_to_ptr.vmem [resolvable:$true] %s1818_s22 }
 0x894   :  { %1684 = vrot.lane.b32.xlu1 %v2485_v2, %s1927_s20 }
 0x89b   :  { %1606 = vrot.lane.b32.xlu0 %v1678_v3, %s1931_s23  ;;  %1544 = vrot.lane.b32.xlu2 %v2485_v2, %s1934_s26 }
 0x89c   :  { %1542 = vrot.lane.b32.xlu1 %v2488_v4, %s1934_s26 }
 0x8a3   :  { %1586 = vrot.lane.b32.xlu0 %v1678_v3, %s1932_s24  ;;  %1546 = vrot.lane.b32.xlu2 %v1678_v3, %s1934_s26 }
 0x8a4   :  { %1566 = vrot.lane.b32.xlu1 %v1678_v3, %s1933_s25  ;;  %s1820_s25 = sshll.u32 %s2578_s4, 4  ;;  %s1821_s25 = int_to_ptr.hbm [resolvable:$true] %s1820_s25 }
 0x8ab   :  { %1729 = vperm.xlu0 %1871, %v1854_v5  }
 0x8c5   :  { %v1663_v6 = vpop.permute.xlu2 %1662 }
 0x8cd   :  { %v1645_v8 = vpop.permute.xlu2 %1644 }
 0x8d5   :  { %v1625_v9 = vpop.permute.xlu2 %1624 }
 0x8dd   :  { %v1683_v10 = vpop.permute.xlu0 %1682  ;;  %v1605_v11 = vpop.permute.xlu2 %1604 }
 0x8de   :  { %v1643_v13 = vpop.permute.xlu1 %1642 }
 0x8df   :  { %v1648_v14 = vsel %vm165_vm3, %v1643_v13, %v1645_v8 }
 0x8e5   :  { %v1665_v17 = vpop.permute.xlu0 %1664  ;;  %v1585_v18 = vpop.permute.xlu2 %1584 }
 0x8e6   :  { %v1668_v19 = vsel %vm186_vm2, %v1663_v6, %v1665_v17  ;;  %v1623_v20 = vpop.permute.xlu1 %1622 }
 0x8e7   :  { %v1628_v21 = vsel %vm2608_vm7, %v1623_v20, %v1625_v9 }
 0x8ed   :  { %v1687_v22 = vpop.permute.xlu0 %1686  ;;  %v1565_v23 = vpop.permute.xlu2 %1564 }
 0x8ee   :  { %1695 = vst.msk [vmem:[#allocation4 + $0xd0] sm:$0xff] %vm46_vm0, %v1687_v22  ;;  %v1603_v24 = vpop.permute.xlu1 %1602 }
 0x8ef   :  { %v1608_v25 = vsel %vm123_vm5, %v1603_v24, %v1605_v11 }
 0x8f5   :  { %v1667_v27 = vpop.permute.xlu0 %1666  ;;  %v1545_v29 = vpop.permute.xlu2 %1544  ;;  %v1724_v26 = vld [vmem:[#allocation4 + $0xd0] sm:$0xff] }
 0x8f6   :  { %v1669_v30 = vsel %vm186_vm2, %v1665_v17, %v1667_v27  ;;  %1675 = vst.msk [vmem:[#allocation4 + $0xb8] sm:$0xff] %vm46_vm0, %v1667_v27  ;;  %v1583_v31 = vpop.permute.xlu1 %1582  ;;  %1782 = vmatpush.msra.mxu1 %v1724_v26  ;;  %vm2610_vm2 = vmmov %vm2608_vm7 }
 0x8f7   :  { %v1588_v32 = vsel %vm2609_vm15, %v1583_v31, %v1585_v18 }
 0x8fd   :  { %v1647_v28 = vpop.permute.xlu0 %1646  ;;  %v1547_v33 = vpop.permute.xlu2 %1546  ;;  %v1721_v34 = vld [vmem:[#allocation4 + $0xb8] sm:$0xff] }
 0x8fe   :  { %v1649_v35 = vsel %vm165_vm3, %v1645_v8, %v1647_v28  ;;  %1655 = vst.msk [vmem:[#allocation4 + $0xa0] sm:$0xff] %vm46_vm0, %v1647_v28  ;;  %v1549_v36 = vsel %vm60_vm9, %v1545_v29, %v1547_v33  ;;  %v1563_v12 = vpop.permute.xlu1 %1562  ;;  %1783 = vmatpush.msra.mxu1 %v1721_v34  ;;  %vm2612_vm3 = vmmov %vm2606_vm4 }
 0x8ff   :  { %v1568_v15 = vsel %vm81_vm8, %v1563_v12, %v1565_v23  ;;  %1555 = vst.msk [vmem:[#allocation4 + $0x28] sm:$0xff] %vm46_vm0, %v1547_v33 }
 0x905   :  { %v1627_v16 = vpop.permute.xlu0 %1626  ;;  %v1718_v37 = vld [vmem:[#allocation4 + $0xa0] sm:$0xff] }
 0x906   :  { %v1629_v39 = vsel %vm2610_vm2, %v1625_v9, %v1627_v16  ;;  %1635 = vst.msk [vmem:[#allocation4 + $0x88] sm:$0xff] %vm46_vm0, %v1627_v16  ;;  %v1685_v42 = vpop.permute.xlu1 %1684  ;;  %1784 = vmatpush.msra.mxu1 %v1718_v37  ;;  %v1703_v58 = vld [vmem:[#allocation4 + $0x28] sm:$0xff] }
 0x907   :  { %v1688_v43 = vsel %vm207_vm1, %v1683_v10, %v1685_v42  ;;  %v1689_v44 = vsel %vm207_vm1, %v1685_v42, %v1687_v22  ;;  %vm2611_vm1 = vmmov %vm2609_vm15 }
 0x908   :  { %1742 = vmatpush.msrb.mxu3 %v1688_v43  ;;  %1762 = vmatpush.msra.mxu0 %v1689_v44 }
 0x90a   :  { %1743 = vmatpush.msrb.mxu3 %v1668_v19  ;;  %1763 = vmatpush.msra.mxu0 %v1669_v30 }
 0x90c   :  { %1744 = vmatpush.msrb.mxu3 %v1648_v14  ;;  %1764 = vmatpush.msra.mxu0 %v1649_v35 }
 0x90d   :  { %v1607_v45 = vpop.permute.xlu0 %1606  ;;  %v1715_v46 = vld [vmem:[#allocation4 + $0x88] sm:$0xff] }
 0x90e   :  { %v1609_v47 = vsel %vm123_vm5, %v1605_v11, %v1607_v45  ;;  %1615 = vst.msk [vmem:[#allocation4 + $0x70] sm:$0xff] %vm46_vm0, %v1607_v45  ;;  %v1543_v48 = vpop.permute.xlu1 %1542  ;;  %1785 = vmatpush.msra.mxu1 %v1715_v46  ;;  %1745 = vmatpush.msrb.mxu3 %v1628_v21  ;;  %vm2613_vm5 = vmmov %vm2612_vm3 }
 0x90f   :  { %v1548_v49 = vsel %vm60_vm9, %v1543_v48, %v1545_v29  ;;  %1765 = vmatpush.msra.mxu0 %v1629_v39  ;;  %vm1805_vm9 = vcmask 1041408  }
 0x910   :  { %1746 = vmatpush.msrb.mxu3 %v1608_v25 }
 0x911   :  { %1766 = vmatpush.msra.mxu0 %v1609_v47 }
 0x912   :  { %1747 = vmatpush.msrb.mxu3 %v1588_v32 }
 0x914   :  { %1748 = vmatpush.msrb.mxu3 %v1568_v15 }
 0x915   :  { %v1587_v50 = vpop.permute.xlu0 %1586  ;;  %v1712_v51 = vld [vmem:[#allocation4 + $0x70] sm:$0xff] }
 0x916   :  { %v1589_v52 = vsel %vm2611_vm1, %v1585_v18, %v1587_v50  ;;  %1595 = vst.msk [vmem:[#allocation4 + $0x58] sm:$0xff] %vm46_vm0, %v1587_v50  ;;  %v1567_v53 = vpop.permute.xlu1 %1566  ;;  %1786 = vmatpush.msra.mxu1 %v1712_v51  ;;  %1749 = vmatpush.msrb.mxu3 %v1548_v49 }
 0x917   :  { %v1569_v56 = vsel %vm81_vm8, %v1565_v23, %v1567_v53  ;;  %1767 = vmatpush.msra.mxu0 %v1589_v52  ;;  %1575 = vst.msk [vmem:[#allocation4 + $0x40] sm:$0xff] %vm46_vm0, %v1567_v53  ;;  %vm2614_vm8 = vmmov %vm2612_vm3  ;;  %vm1803_vm0 = vcmask 1040384  }
 0x918   :  { %1750 = vmatpush.msrb.mxu3 %v2488_v4 }
 0x919   :  { %1855 = vmatmul.msk.f32.vlgmr.msrb.gmra.mxu3 %vm2612_vm3, %v1853_v55  ;;  %1768 = vmatpush.msra.mxu0 %v1569_v56 }
 0x91b   :  { %1769 = vmatpush.msra.mxu0 %v1549_v36 }
 0x91d   :  { %v1709_v54 = vld [vmem:[#allocation4 + $0x58] sm:$0xff]  ;;  %1770 = vmatpush.msra.mxu0 %v2485_v2  ;;  %v1730_v62 = vpop.permute.xlu0 %1729  ;;  %v1808_v2 = vlaneseq }
 0x91e   :  { %1787 = vmatpush.msra.mxu1 %v1709_v54  ;;  %1856 = vmatmul.msk.f32.vlgmr.msra.gmra.mxu0 %vm2613_vm5, %v1853_v55  ;;  %v1706_v57 = vld [vmem:[#allocation4 + $0x40] sm:$0xff] }
 0x920   :  { %1788 = vmatpush.msra.mxu1 %v1706_v57 }
 0x922   :  { %1789 = vmatpush.msra.mxu1 %v1703_v58 }
 0x924   :  { %1790 = vmatpush.msra.mxu1 %v1700_v40 }
 0x925   :  { %1857 = vmatmul.msk.f32.vlgmr.msra.gmra.mxu1 %vm2614_vm8, %v1853_v55 }
 0x99b   :  { %v1772_v59 = vpop.f32.mrf.mxu0 }
 0x99c   :  { %v1773_v63 = vadd.f32 %v1772_v59, %v1730_v62  ;;  %v1752_v41 = vpop.f32.mrf.mxu3 }
 0x99d   :  { %v1753_v1 = vadd.f32 %v1752_v41, %v1730_v62 }
 0x99e   :  { %v1796_v0 = vsel %vm2054_vm12, %v1773_v63, 0.0  ;;  %vm1810_vm12 = vcmp.lt.s32.totalorder %v1808_v2, 324 }
 0x99f   :  { %v1801_v4 = vrot.slane %v1796_v0, 7  ;;  %v1795_v61 = vsel %vm2050_vm11, %v1753_v1, 0.0 }
 0x9a1   :  { %v1804_v8 = vsel %vm1803_vm0, %v1795_v61, %v1801_v4 }
 0x9a2   :  { %v1792_v38 = vpop.f32.mrf.mxu1 }
 0x9a3   :  { %v1793_v3 = vadd.f32 %v1792_v38, %v1730_v62 }
 0x9a5   :  { %v1797_v5 = vsel %vm2064_vm13, %v1793_v3, 0.0 }
 0x9a6   :  { %v1802_v6 = vrot.slane %v1797_v5, 6 }
 0x9a8   :  { %v1806_v9 = vsel %vm1805_vm9, %v1804_v8, %v1802_v6 }
 0x9a9   :  { %1812 = vst.msk [vmem:[#allocation8] sm:$0x7] %vm1810_vm12, %v1806_v9 }
 0x9aa   :  { %1823 = dma.vmem_to_hbm [thread:$0]  %s1819_s22, 48, %s1821_s25, [#allocation7]  }
 0x9ab   :  { %1924 = dma.done.wait [#allocation7], 48  }
 0x9ac   :  { %1925 = vsyncadd [#allocation7], 4294967248 }
 0x9ad   :  { %1828 = vsyncpa [#allocation6], 1 }
 0x9ae   :  { %1829 = vsyncpa [#allocation7], 1 }

</bundles_post_ra>
